<compile_context>
chip_gen: v5e
topology: v5e:2x2
jax: 0.10.0
libtpu: 0.0.40
codegen_flags: <defaults>
</compile_context>

<pallas_src>
import functools
import math

import jax
import jax.numpy as jnp
import numpy as np
from jax.experimental import pallas as pl
from jax.experimental.pallas import tpu as pltpu

_SQRT_2_OVER_PI = 0.7978845608028654


def _gelu_tanh(x):
    # TODO(synk): PyTorch nn.GELU defaults to the exact erf form; Mosaic has no
    # erf lowering, so the tanh approximation is used (max abs err ~1e-3).
    return 0.5 * x * (1.0 + jnp.tanh(_SQRT_2_OVER_PI * (x + 0.044715 * x * x * x)))


def _finet_ghost_kernel(x_ref, w1_ref, w2_ref, pp_ref, o_ref, *, H, W, HWp, g, P):
    f32 = jnp.float32
    G = P * g                               # packed (image-major) rows per ghost half

    x = x_ref[0].astype(f32)                # (P*Cin, HWp)
    w1 = w1_ref[...].astype(f32)            # (2G, P*Cin)  blockdiag [conv1.primary ; identity.primary]
    w2 = w2_ref[...].astype(f32)            # (G, 2G)      blockdiag [conv2.primary | a-half, b-half]
    pp = pp_ref[...].astype(f32)            # (2G, 13)     packed per-channel params

    # ---- unpack the packed per-channel parameters ---------------------------
    b1i = pp[:, 0:1]                        # (2G,1) [conv1.primary bias ; identity.primary bias]
    w1d = pp[:G, 1:10]                      # (G,9)  conv1 cheap (dw 3x3) weights
    w2d = pp[G:, 1:10]                      # (G,9)  conv2 cheap weights
    b1d = pp[:G, 10:11]                     # (G,1)  conv1 cheap bias
    b2d = pp[G:, 10:11]                     # (G,1)  conv2 cheap bias
    b2p = pp[:G, 11:12]                     # (G,1)  conv2 primary bias
    wid = pp[G:, 11:12]                     # (G,1)  identity cheap (dw 1x1) weight
    bid = pp[G:, 12:13]                     # (G,1)  identity cheap bias

    # ---- boundary masks from an in-kernel lane iota (no HW-sized DMA input) --
    idx = jax.lax.broadcasted_iota(jnp.int32, (1, HWp), 1)
    if (W & (W - 1)) == 0:
        col = jnp.bitwise_and(idx, W - 1)
    else:
        col = idx % W
    m_left = (col != 0).astype(f32)         # zeroes col 0     (source mask for kw=+1 taps)
    m_right = (col != W - 1).astype(f32)    # zeroes col W-1   (source mask for kw=-1 taps)
    m_top = (idx >= W).astype(f32)          # zeroes row 0     (output mask for kh=-1 taps)
    m_bot = 1.0 - ((idx >= (H - 1) * W) & (idx < H * W)).astype(f32)  # zeroes row H-1 (kh=+1)

    def pointwise(w, xin, b):
        """1x1 conv: (M, K) @ (K, HWp) + b — channels on sublanes, HWp on lanes."""
        # TODO(synk): for the x-fed call this could use stride-0 sublane
        # broadcast ref loads (x_ref[pl.ds(c, M, stride=0), :]) to move the
        # per-c broadcast onto the vld slot.
        M, K = w.shape
        if K <= 16:
            acc = w[:, 0:1] * xin[0:1, :]
            for c in range(1, K):
                acc = acc + w[:, c:c + 1] * xin[c:c + 1, :]
        else:
            acc = jnp.dot(w, xin, preferred_element_type=f32,
                          precision=jax.lax.Precision.HIGHEST)
        return acc + b

    def pointwise2(wa, xa, wb, xb, b):
        """Split 1x1 conv: wa @ xa + wb @ xb + b with one shared accumulator."""
        M, K = wa.shape
        if K <= 16:
            acc = wa[:, 0:1] * xa[0:1, :]
            for c in range(1, K):
                acc = acc + wa[:, c:c + 1] * xa[c:c + 1, :]
            for c in range(K):
                acc = acc + wb[:, c:c + 1] * xb[c:c + 1, :]
        else:
            acc = (jnp.dot(wa, xa, preferred_element_type=f32,
                           precision=jax.lax.Precision.HIGHEST)
                   + jnp.dot(wb, xb, preferred_element_type=f32,
                             precision=jax.lax.Precision.HIGHEST))
        return acc + b

    def depthwise3x3(xg, wd, bd):
        """Depthwise 3x3 (stride 1, pad 1) on a flattened (rows, H*W) tile.

        Each tap is a pltpu.roll lane rotation of the flattened tile.  Column
        wraparound across row boundaries is removed by masking the *source*
        (col 0 for +1 shifts, col W-1 for -1 shifts); top/bottom circular
        wraparound is removed by masking the *output* rows per kh.
        """
        src = (xg * m_right, xg, xg * m_left)          # sources for kw = 0, 1, 2
        out = None
        for kh in range(3):
            part = None
            for kw in range(3):
                s = (kh - 1) * W + (kw - 1)            # flattened source offset
                tap = src[kw]
                if s != 0:
                    tap = pltpu.roll(tap, shift=(-s) % HWp, axis=1)
                k = 3 * kh + kw
                term = tap * wd[:, k:k + 1]
                part = term if part is None else part + term
            if kh == 0:
                part = part * m_top
            elif kh == 2:
                part = part * m_bot
            out = part if out is None else out + part
        return out + bd

    # ---- stage 1: conv1.primary and identity.primary share x ----------------
    t = pointwise(w1, x, b1i)                          # (2G, HWp) = [a1 ; ai], image-major
    a1 = t[:G, :]                                      # conv1 primary (pre-act)
    ai = t[G:, :]                                      # identity primary

    # ---- conv1 = GhostConv(in_c -> out_c, dw 3x3), then GELU (no concat) -----
    b1 = depthwise3x3(a1, w1d, b1d)
    g1a = _gelu_tanh(a1)
    g1b = _gelu_tanh(b1)

    # ---- conv2 = GhostConv(out_c -> out_c, dw 3x3), then GELU ----------------
    a2 = pointwise2(w2[:, :G], g1a, w2[:, G:], g1b, b2p)   # (G, HWp)
    b2 = depthwise3x3(a2, w2d, b2d)
    a2 = _gelu_tanh(a2)
    b2 = _gelu_tanh(b2)

    # ---- identity cheap half (dw 1x1, pad 0): per-channel scale + shift ------
    bi = ai * wid + bid

    ya = a2 + ai                                       # per-image primary output half
    yb = b2 + bi                                       # per-image cheap output half

    # ---- residual + ghost concat realised as direct sub-block stores --------
    for p in range(P):
        o_ref[0, p * 2 * g:p * 2 * g + g, :] = ya[p * g:(p + 1) * g, :].astype(o_ref.dtype)
        o_ref[0, p * 2 * g + g:(p + 1) * 2 * g, :] = yb[p * g:(p + 1) * g, :].astype(o_ref.dtype)


def finet_ghost_conv(x, params):
    """x: (N, Cin, H, W) NCHW float32.  Returns (None, y), y: (N, Cout, H, W)."""
    N, Cin, H, W = x.shape
    g = params["w1p"].shape[0]
    Cout = 2 * g
    HW = H * W
    f32 = jnp.float32

    # ---- lane-dense spatial padding (whole zero rows) ------------------------
    if HW % 128 == 0:
        Hp = H
    else:
        row_align = 128 // math.gcd(W, 128)
        Hp = -(-H // row_align) * row_align
    HWp = Hp * W

    # ---- pack P images onto the sublane dim when the ghost width g < 8 ------
    P = 1
    if g < 8:
        for cand in range(min(N, max(1, 8 // g)), 1, -1):
            if N % cand == 0:
                P = cand
                break
    G = P * g
    PC = P * Cin

    # ---- host-side parameter packing -----------------------------------------
    eye = jnp.eye(P, dtype=f32)
    # Block-diagonal 1x1 weights so the packed images never mix.
    w1bd = jnp.concatenate([jnp.kron(eye, params["w1p"]),
                            jnp.kron(eye, params["wip"])], axis=0)        # (2G, PC)
    w2bd = jnp.concatenate([jnp.kron(eye, params["w2p"][:, :g]),
                            jnp.kron(eye, params["w2p"][:, g:])], axis=1)  # (G, 2G)

    tile = lambda v: jnp.tile(v.reshape(g, -1).astype(f32), (P, 1))
    top = jnp.concatenate([tile(params["b1p"]),
                           tile(params["w1d"].reshape(g, 9)),
                           tile(params["b1d"]),
                           tile(params["b2p"]),
                           jnp.zeros((G, 1), f32)], axis=1)                # (G, 13)
    bot = jnp.concatenate([tile(params["bip"]),
                           tile(params["w2d"].reshape(g, 9)),
                           tile(params["b2d"]),
                           tile(params["wid"]),
                           tile(params["bid"])], axis=1)                   # (G, 13)
    pp = jnp.concatenate([top, bot], axis=0)                               # (2G, 13)

    xf = x.reshape(N, Cin, HW)
    if HWp != HW:
        xf = jnp.pad(xf, ((0, 0), (0, 0), (0, HWp - HW)))
    xf = xf.reshape(N // P, PC, HWp)

    kernel = functools.partial(_finet_ghost_kernel, H=H, W=W, HWp=HWp, g=g, P=P)

    in_specs = [
        pl.BlockSpec((1, PC, HWp), lambda n: (n, 0, 0)),
        pl.BlockSpec((2 * G, PC), lambda n: (0, 0)),
        pl.BlockSpec((G, 2 * G), lambda n: (0, 0)),
        pl.BlockSpec((2 * G, 13), lambda n: (0, 0)),
    ]
    out_specs = pl.BlockSpec((1, P * Cout, HWp), lambda n: (n, 0, 0))

    y = pl.pallas_call(
        kernel,
        grid=(N // P,),
        in_specs=in_specs,
        out_specs=out_specs,
        out_shape=jax.ShapeDtypeStruct((N // P, P * Cout, HWp), x.dtype),
        compiler_params=pltpu.CompilerParams(dimension_semantics=("parallel",)),
    )(xf, w1bd, w2bd, pp)

    y = y.reshape(N, Cout, HWp)
    if HWp != HW:
        y = y[:, :, :HW]
    y = y.reshape(N, Cout, H, W)
    # TODO(synk): for very large H*W add a second "parallel" grid axis tiling H
    # into row blocks (1-row halo) with per-generation vmem_limit_bytes budgets
    # (v7x: 64 MiB physical / 32 MiB scoped) so both v7x TensorCores get work.
    # The downsample (4x4 s2 conv), csff_enc/csff_dec and
    # FractionalInstanceNorm2d branches are disabled in this configuration
    # (downsample=False, use_csff=False, use_norm=False) -> return (None, y).
    return None, y


# ---------------------------- pure-JAX reference -----------------------------
def _ghost_ref(x, wp, bp, wd, bd, dw_k):
    prec = jax.lax.Precision.HIGHEST
    x1 = jnp.einsum("oc,nchw->nohw", wp, x, precision=prec) + bp[None, :, None, None]
    if dw_k == 1:
        x2 = x1 * wd[None, :, None, None] + bd[None, :, None, None]
    else:
        H, W = x.shape[2], x.shape[3]
        xp = jnp.pad(x1, ((0, 0), (0, 0), (1, 1), (1, 1)))
        x2 = jnp.zeros_like(x1)
        for kh in range(3):
            for kw in range(3):
                wk = wd[:, kh, kw][None, :, None, None]
                x2 = x2 + xp[:, :, kh:kh + H, kw:kw + W] * wk
        x2 = x2 + bd[None, :, None, None]
    return jnp.concatenate([x1, x2], axis=1)


def _finet_ref(x, p):
    y = _gelu_tanh(_ghost_ref(x, p["w1p"], p["b1p"], p["w1d"], p["b1d"], 3))
    y = _gelu_tanh(_ghost_ref(y, p["w2p"], p["b2p"], p["w2d"], p["b2d"], 3))
    y = y + _ghost_ref(x, p["wip"], p["bip"], p["wid"], p["bid"], 1)
    return y


if __name__ == "__main__":
    N, Cin, Cout, H, W = 2, 4, 8, 16, 16
    g = Cout // 2

    key = jax.random.PRNGKey(0)
    ks = jax.random.split(key, 13)
    r = lambda k, shape, s=0.2: s * jax.random.normal(k, shape, jnp.float32)

    # Deterministic synthetic parameters (shapes follow the module's __init__).
    params = {
        "w1p": r(ks[0], (g, Cin)),   "b1p": r(ks[1], (g,)),    # conv1 primary 1x1
        "w1d": r(ks[2], (g, 3, 3)),  "b1d": r(ks[3], (g,)),    # conv1 cheap dw 3x3
        "w2p": r(ks[4], (g, Cout)),  "b2p": r(ks[5], (g,)),    # conv2 primary 1x1
        "w2d": r(ks[6], (g, 3, 3)),  "b2d": r(ks[7], (g,)),    # conv2 cheap dw 3x3
        "wip": r(ks[8], (g, Cin)),   "bip": r(ks[9], (g,)),    # identity primary 1x1
        "wid": r(ks[10], (g,)),      "bid": r(ks[11], (g,)),   # identity cheap dw 1x1
    }
    x = jax.random.normal(ks[12], (N, Cin, H, W), jnp.float32)

    y_down, y = finet_ghost_conv(x, params)
    y = jax.block_until_ready(y)
    assert y_down is None and y.shape == (N, Cout, H, W)

    y_ref = _finet_ref(x, params)
    np.testing.assert_allclose(np.asarray(y), np.asarray(y_ref), atol=2e-4, rtol=2e-4)
    print("KERNEL_OK")
</pallas_src>

<mosaic_0001>
module attributes {stable_mosaic.version = 11 : i64} {
  func.func @_finet_ghost_kernel(%arg0: i32, %arg1: memref<1x8x256xf32, #tpu.memory_space<vmem>>, %arg2: memref<16x8xf32, #tpu.memory_space<vmem>>, %arg3: memref<8x16xf32, #tpu.memory_space<vmem>>, %arg4: memref<16x13xf32, #tpu.memory_space<vmem>>, %arg5: memref<1x16x256xf32, #tpu.memory_space<vmem>>) attributes {dimension_semantics = [#tpu.dimension_semantics<parallel>], iteration_bounds = array<i64: 1>, scalar_prefetch = 0 : i64, scratch_operands = 0 : i64, tpu.core_type = #tpu.core_type<tc>, window_params = [{transform_indices = @transform_0, window_bounds = array<i64: 1, 8, 256>}, {pipeline_mode = #tpu.pipeline_mode<synchronous>, transform_indices = @transform_1, window_bounds = array<i64: 16, 8>}, {pipeline_mode = #tpu.pipeline_mode<synchronous>, transform_indices = @transform_2, window_bounds = array<i64: 8, 16>}, {pipeline_mode = #tpu.pipeline_mode<synchronous>, transform_indices = @transform_3, window_bounds = array<i64: 16, 13>}, {transform_indices = @transform_4, window_bounds = array<i64: 1, 16, 256>}]} {
    %c0 = arith.constant 0 : index
    %c0_0 = arith.constant 0 : index
    %c0_1 = arith.constant 0 : index
    %0 = vector.load %arg1[%c0, %c0_0, %c0_1] : memref<1x8x256xf32, #tpu.memory_space<vmem>>, vector<1x8x256xf32>
    %1 = vector.shape_cast %0 : vector<1x8x256xf32> to vector<8x256xf32>
    %c0_2 = arith.constant 0 : index
    %c0_3 = arith.constant 0 : index
    %2 = vector.load %arg2[%c0_2, %c0_3] : memref<16x8xf32, #tpu.memory_space<vmem>>, vector<16x8xf32>
    %c0_4 = arith.constant 0 : index
    %c0_5 = arith.constant 0 : index
    %3 = vector.load %arg3[%c0_4, %c0_5] : memref<8x16xf32, #tpu.memory_space<vmem>>, vector<8x16xf32>
    %c0_6 = arith.constant 0 : index
    %c0_7 = arith.constant 0 : index
    %4 = vector.load %arg4[%c0_6, %c0_7] : memref<16x13xf32, #tpu.memory_space<vmem>>, vector<16x13xf32>
    %5 = vector.extract_strided_slice %4 {offsets = [0, 0], sizes = [16, 1], strides = [1, 1]} : vector<16x13xf32> to vector<16x1xf32>
    %6 = vector.extract_strided_slice %4 {offsets = [0, 1], sizes = [8, 9], strides = [1, 1]} : vector<16x13xf32> to vector<8x9xf32>
    %7 = vector.extract_strided_slice %4 {offsets = [8, 1], sizes = [8, 9], strides = [1, 1]} : vector<16x13xf32> to vector<8x9xf32>
    %8 = vector.extract_strided_slice %4 {offsets = [0, 10], sizes = [8, 1], strides = [1, 1]} : vector<16x13xf32> to vector<8x1xf32>
    %9 = vector.extract_strided_slice %4 {offsets = [8, 10], sizes = [8, 1], strides = [1, 1]} : vector<16x13xf32> to vector<8x1xf32>
    %10 = vector.extract_strided_slice %4 {offsets = [0, 11], sizes = [8, 1], strides = [1, 1]} : vector<16x13xf32> to vector<8x1xf32>
    %11 = vector.extract_strided_slice %4 {offsets = [8, 11], sizes = [8, 1], strides = [1, 1]} : vector<16x13xf32> to vector<8x1xf32>
    %12 = vector.extract_strided_slice %4 {offsets = [8, 12], sizes = [8, 1], strides = [1, 1]} : vector<16x13xf32> to vector<8x1xf32>
    %13 = tpu.iota {dimensions = array<i32: 1>} : vector<1x256xi32>
    %c15_i32 = arith.constant 15 : i32
    %14 = vector.broadcast %c15_i32 : i32 to vector<1x256xi32>
    %15 = arith.andi %13, %14 : vector<1x256xi32>
    %c0_i32 = arith.constant 0 : i32
    %16 = vector.broadcast %c0_i32 : i32 to vector<1x256xi32>
    %17 = arith.cmpi ne, %15, %16 : vector<1x256xi32>
    %18 = arith.extui %17 : vector<1x256xi1> to vector<1x256xi32>
    %19 = arith.sitofp %18 : vector<1x256xi32> to vector<1x256xf32>
    %c15_i32_8 = arith.constant 15 : i32
    %20 = vector.broadcast %c15_i32_8 : i32 to vector<1x256xi32>
    %21 = arith.cmpi ne, %15, %20 : vector<1x256xi32>
    %22 = arith.extui %21 : vector<1x256xi1> to vector<1x256xi32>
    %23 = arith.sitofp %22 : vector<1x256xi32> to vector<1x256xf32>
    %c16_i32 = arith.constant 16 : i32
    %24 = vector.broadcast %c16_i32 : i32 to vector<1x256xi32>
    %25 = arith.cmpi sge, %13, %24 : vector<1x256xi32>
    %26 = arith.extui %25 : vector<1x256xi1> to vector<1x256xi32>
    %27 = arith.sitofp %26 : vector<1x256xi32> to vector<1x256xf32>
    %c240_i32 = arith.constant 240 : i32
    %28 = vector.broadcast %c240_i32 : i32 to vector<1x256xi32>
    %29 = arith.cmpi sge, %13, %28 : vector<1x256xi32>
    %c256_i32 = arith.constant 256 : i32
    %30 = vector.broadcast %c256_i32 : i32 to vector<1x256xi32>
    %31 = arith.cmpi slt, %13, %30 : vector<1x256xi32>
    %32 = arith.andi %29, %31 : vector<1x256xi1>
    %33 = arith.extui %32 : vector<1x256xi1> to vector<1x256xi32>
    %34 = arith.sitofp %33 : vector<1x256xi32> to vector<1x256xf32>
    %cst = arith.constant 1.000000e+00 : f32
    %35 = vector.broadcast %cst : f32 to vector<1x256xf32>
    %36 = arith.subf %35, %34 : vector<1x256xf32>
    %37 = vector.extract_strided_slice %2 {offsets = [0, 0], sizes = [16, 1], strides = [1, 1]} : vector<16x8xf32> to vector<16x1xf32>
    %38 = vector.extract_strided_slice %1 {offsets = [0, 0], sizes = [1, 256], strides = [1, 1]} : vector<8x256xf32> to vector<1x256xf32>
    %39 = vector.broadcast %37 : vector<16x1xf32> to vector<16x256xf32>
    %40 = vector.broadcast %38 : vector<1x256xf32> to vector<16x256xf32>
    %41 = arith.mulf %39, %40 : vector<16x256xf32>
    %42 = vector.extract_strided_slice %2 {offsets = [0, 1], sizes = [16, 1], strides = [1, 1]} : vector<16x8xf32> to vector<16x1xf32>
    %43 = vector.extract_strided_slice %1 {offsets = [1, 0], sizes = [1, 256], strides = [1, 1]} : vector<8x256xf32> to vector<1x256xf32>
    %44 = vector.broadcast %42 : vector<16x1xf32> to vector<16x256xf32>
    %45 = vector.broadcast %43 : vector<1x256xf32> to vector<16x256xf32>
    %46 = arith.mulf %44, %45 : vector<16x256xf32>
    %47 = arith.addf %41, %46 : vector<16x256xf32>
    %48 = vector.extract_strided_slice %2 {offsets = [0, 2], sizes = [16, 1], strides = [1, 1]} : vector<16x8xf32> to vector<16x1xf32>
    %49 = vector.extract_strided_slice %1 {offsets = [2, 0], sizes = [1, 256], strides = [1, 1]} : vector<8x256xf32> to vector<1x256xf32>
    %50 = vector.broadcast %48 : vector<16x1xf32> to vector<16x256xf32>
    %51 = vector.broadcast %49 : vector<1x256xf32> to vector<16x256xf32>
    %52 = arith.mulf %50, %51 : vector<16x256xf32>
    %53 = arith.addf %47, %52 : vector<16x256xf32>
    %54 = vector.extract_strided_slice %2 {offsets = [0, 3], sizes = [16, 1], strides = [1, 1]} : vector<16x8xf32> to vector<16x1xf32>
    %55 = vector.extract_strided_slice %1 {offsets = [3, 0], sizes = [1, 256], strides = [1, 1]} : vector<8x256xf32> to vector<1x256xf32>
    %56 = vector.broadcast %54 : vector<16x1xf32> to vector<16x256xf32>
    %57 = vector.broadcast %55 : vector<1x256xf32> to vector<16x256xf32>
    %58 = arith.mulf %56, %57 : vector<16x256xf32>
    %59 = arith.addf %53, %58 : vector<16x256xf32>
    %60 = vector.extract_strided_slice %2 {offsets = [0, 4], sizes = [16, 1], strides = [1, 1]} : vector<16x8xf32> to vector<16x1xf32>
    %61 = vector.extract_strided_slice %1 {offsets = [4, 0], sizes = [1, 256], strides = [1, 1]} : vector<8x256xf32> to vector<1x256xf32>
    %62 = vector.broadcast %60 : vector<16x1xf32> to vector<16x256xf32>
    %63 = vector.broadcast %61 : vector<1x256xf32> to vector<16x256xf32>
    %64 = arith.mulf %62, %63 : vector<16x256xf32>
    %65 = arith.addf %59, %64 : vector<16x256xf32>
    %66 = vector.extract_strided_slice %2 {offsets = [0, 5], sizes = [16, 1], strides = [1, 1]} : vector<16x8xf32> to vector<16x1xf32>
    %67 = vector.extract_strided_slice %1 {offsets = [5, 0], sizes = [1, 256], strides = [1, 1]} : vector<8x256xf32> to vector<1x256xf32>
    %68 = vector.broadcast %66 : vector<16x1xf32> to vector<16x256xf32>
    %69 = vector.broadcast %67 : vector<1x256xf32> to vector<16x256xf32>
    %70 = arith.mulf %68, %69 : vector<16x256xf32>
    %71 = arith.addf %65, %70 : vector<16x256xf32>
    %72 = vector.extract_strided_slice %2 {offsets = [0, 6], sizes = [16, 1], strides = [1, 1]} : vector<16x8xf32> to vector<16x1xf32>
    %73 = vector.extract_strided_slice %1 {offsets = [6, 0], sizes = [1, 256], strides = [1, 1]} : vector<8x256xf32> to vector<1x256xf32>
    %74 = vector.broadcast %72 : vector<16x1xf32> to vector<16x256xf32>
    %75 = vector.broadcast %73 : vector<1x256xf32> to vector<16x256xf32>
    %76 = arith.mulf %74, %75 : vector<16x256xf32>
    %77 = arith.addf %71, %76 : vector<16x256xf32>
    %78 = vector.extract_strided_slice %2 {offsets = [0, 7], sizes = [16, 1], strides = [1, 1]} : vector<16x8xf32> to vector<16x1xf32>
    %79 = vector.extract_strided_slice %1 {offsets = [7, 0], sizes = [1, 256], strides = [1, 1]} : vector<8x256xf32> to vector<1x256xf32>
    %80 = vector.broadcast %78 : vector<16x1xf32> to vector<16x256xf32>
    %81 = vector.broadcast %79 : vector<1x256xf32> to vector<16x256xf32>
    %82 = arith.mulf %80, %81 : vector<16x256xf32>
    %83 = arith.addf %77, %82 : vector<16x256xf32>
    %84 = vector.broadcast %5 : vector<16x1xf32> to vector<16x256xf32>
    %85 = arith.addf %83, %84 : vector<16x256xf32>
    %86 = vector.extract_strided_slice %85 {offsets = [0, 0], sizes = [8, 256], strides = [1, 1]} : vector<16x256xf32> to vector<8x256xf32>
    %87 = vector.extract_strided_slice %85 {offsets = [8, 0], sizes = [8, 256], strides = [1, 1]} : vector<16x256xf32> to vector<8x256xf32>
    %88 = vector.broadcast %23 : vector<1x256xf32> to vector<8x256xf32>
    %89 = arith.mulf %86, %88 : vector<8x256xf32>
    %90 = vector.broadcast %19 : vector<1x256xf32> to vector<8x256xf32>
    %91 = arith.mulf %86, %90 : vector<8x256xf32>
    %c17_i32 = arith.constant 17 : i32
    %92 = tpu.dynamic_rotate %89 by %c17_i32 dim 1 : vector<8x256xf32>, i32 -> vector<8x256xf32>
    %93 = vector.extract_strided_slice %6 {offsets = [0, 0], sizes = [8, 1], strides = [1, 1]} : vector<8x9xf32> to vector<8x1xf32>
    %94 = vector.broadcast %93 : vector<8x1xf32> to vector<8x256xf32>
    %95 = arith.mulf %92, %94 : vector<8x256xf32>
    %c16_i32_9 = arith.constant 16 : i32
    %96 = tpu.dynamic_rotate %86 by %c16_i32_9 dim 1 : vector<8x256xf32>, i32 -> vector<8x256xf32>
    %97 = vector.extract_strided_slice %6 {offsets = [0, 1], sizes = [8, 1], strides = [1, 1]} : vector<8x9xf32> to vector<8x1xf32>
    %98 = vector.broadcast %97 : vector<8x1xf32> to vector<8x256xf32>
    %99 = arith.mulf %96, %98 : vector<8x256xf32>
    %100 = arith.addf %95, %99 : vector<8x256xf32>
    %c15_i32_10 = arith.constant 15 : i32
    %101 = tpu.dynamic_rotate %91 by %c15_i32_10 dim 1 : vector<8x256xf32>, i32 -> vector<8x256xf32>
    %102 = vector.extract_strided_slice %6 {offsets = [0, 2], sizes = [8, 1], strides = [1, 1]} : vector<8x9xf32> to vector<8x1xf32>
    %103 = vector.broadcast %102 : vector<8x1xf32> to vector<8x256xf32>
    %104 = arith.mulf %101, %103 : vector<8x256xf32>
    %105 = arith.addf %100, %104 : vector<8x256xf32>
    %106 = vector.broadcast %27 : vector<1x256xf32> to vector<8x256xf32>
    %107 = arith.mulf %105, %106 : vector<8x256xf32>
    %c1_i32 = arith.constant 1 : i32
    %108 = tpu.dynamic_rotate %89 by %c1_i32 dim 1 : vector<8x256xf32>, i32 -> vector<8x256xf32>
    %109 = vector.extract_strided_slice %6 {offsets = [0, 3], sizes = [8, 1], strides = [1, 1]} : vector<8x9xf32> to vector<8x1xf32>
    %110 = vector.broadcast %109 : vector<8x1xf32> to vector<8x256xf32>
    %111 = arith.mulf %108, %110 : vector<8x256xf32>
    %112 = vector.extract_strided_slice %6 {offsets = [0, 4], sizes = [8, 1], strides = [1, 1]} : vector<8x9xf32> to vector<8x1xf32>
    %113 = vector.broadcast %112 : vector<8x1xf32> to vector<8x256xf32>
    %114 = arith.mulf %86, %113 : vector<8x256xf32>
    %115 = arith.addf %111, %114 : vector<8x256xf32>
    %c255_i32 = arith.constant 255 : i32
    %116 = tpu.dynamic_rotate %91 by %c255_i32 dim 1 : vector<8x256xf32>, i32 -> vector<8x256xf32>
    %117 = vector.extract_strided_slice %6 {offsets = [0, 5], sizes = [8, 1], strides = [1, 1]} : vector<8x9xf32> to vector<8x1xf32>
    %118 = vector.broadcast %117 : vector<8x1xf32> to vector<8x256xf32>
    %119 = arith.mulf %116, %118 : vector<8x256xf32>
    %120 = arith.addf %115, %119 : vector<8x256xf32>
    %121 = arith.addf %107, %120 : vector<8x256xf32>
    %c241_i32 = arith.constant 241 : i32
    %122 = tpu.dynamic_rotate %89 by %c241_i32 dim 1 : vector<8x256xf32>, i32 -> vector<8x256xf32>
    %123 = vector.extract_strided_slice %6 {offsets = [0, 6], sizes = [8, 1], strides = [1, 1]} : vector<8x9xf32> to vector<8x1xf32>
    %124 = vector.broadcast %123 : vector<8x1xf32> to vector<8x256xf32>
    %125 = arith.mulf %122, %124 : vector<8x256xf32>
    %c240_i32_11 = arith.constant 240 : i32
    %126 = tpu.dynamic_rotate %86 by %c240_i32_11 dim 1 : vector<8x256xf32>, i32 -> vector<8x256xf32>
    %127 = vector.extract_strided_slice %6 {offsets = [0, 7], sizes = [8, 1], strides = [1, 1]} : vector<8x9xf32> to vector<8x1xf32>
    %128 = vector.broadcast %127 : vector<8x1xf32> to vector<8x256xf32>
    %129 = arith.mulf %126, %128 : vector<8x256xf32>
    %130 = arith.addf %125, %129 : vector<8x256xf32>
    %c239_i32 = arith.constant 239 : i32
    %131 = tpu.dynamic_rotate %91 by %c239_i32 dim 1 : vector<8x256xf32>, i32 -> vector<8x256xf32>
    %132 = vector.extract_strided_slice %6 {offsets = [0, 8], sizes = [8, 1], strides = [1, 1]} : vector<8x9xf32> to vector<8x1xf32>
    %133 = vector.broadcast %132 : vector<8x1xf32> to vector<8x256xf32>
    %134 = arith.mulf %131, %133 : vector<8x256xf32>
    %135 = arith.addf %130, %134 : vector<8x256xf32>
    %136 = vector.broadcast %36 : vector<1x256xf32> to vector<8x256xf32>
    %137 = arith.mulf %135, %136 : vector<8x256xf32>
    %138 = arith.addf %121, %137 : vector<8x256xf32>
    %139 = vector.broadcast %8 : vector<8x1xf32> to vector<8x256xf32>
    %140 = arith.addf %138, %139 : vector<8x256xf32>
    %cst_12 = arith.constant 5.000000e-01 : f32
    %141 = vector.broadcast %cst_12 : f32 to vector<8x256xf32>
    %142 = arith.mulf %141, %86 : vector<8x256xf32>
    %cst_13 = arith.constant 4.471500e-02 : f32
    %143 = vector.broadcast %cst_13 : f32 to vector<8x256xf32>
    %144 = arith.mulf %143, %86 : vector<8x256xf32>
    %145 = arith.mulf %144, %86 : vector<8x256xf32>
    %146 = arith.mulf %145, %86 : vector<8x256xf32>
    %147 = arith.addf %86, %146 : vector<8x256xf32>
    %cst_14 = arith.constant 0.797884583 : f32
    %148 = vector.broadcast %cst_14 : f32 to vector<8x256xf32>
    %149 = arith.mulf %148, %147 : vector<8x256xf32>
    %150 = math.tanh %149 : vector<8x256xf32>
    %cst_15 = arith.constant 1.000000e+00 : f32
    %151 = vector.broadcast %cst_15 : f32 to vector<8x256xf32>
    %152 = arith.addf %151, %150 : vector<8x256xf32>
    %153 = arith.mulf %142, %152 : vector<8x256xf32>
    %cst_16 = arith.constant 5.000000e-01 : f32
    %154 = vector.broadcast %cst_16 : f32 to vector<8x256xf32>
    %155 = arith.mulf %154, %140 : vector<8x256xf32>
    %cst_17 = arith.constant 4.471500e-02 : f32
    %156 = vector.broadcast %cst_17 : f32 to vector<8x256xf32>
    %157 = arith.mulf %156, %140 : vector<8x256xf32>
    %158 = arith.mulf %157, %140 : vector<8x256xf32>
    %159 = arith.mulf %158, %140 : vector<8x256xf32>
    %160 = arith.addf %140, %159 : vector<8x256xf32>
    %cst_18 = arith.constant 0.797884583 : f32
    %161 = vector.broadcast %cst_18 : f32 to vector<8x256xf32>
    %162 = arith.mulf %161, %160 : vector<8x256xf32>
    %163 = math.tanh %162 : vector<8x256xf32>
    %cst_19 = arith.constant 1.000000e+00 : f32
    %164 = vector.broadcast %cst_19 : f32 to vector<8x256xf32>
    %165 = arith.addf %164, %163 : vector<8x256xf32>
    %166 = arith.mulf %155, %165 : vector<8x256xf32>
    %167 = vector.extract_strided_slice %3 {offsets = [0, 0], sizes = [8, 8], strides = [1, 1]} : vector<8x16xf32> to vector<8x8xf32>
    %168 = vector.extract_strided_slice %3 {offsets = [0, 8], sizes = [8, 8], strides = [1, 1]} : vector<8x16xf32> to vector<8x8xf32>
    %169 = vector.extract_strided_slice %167 {offsets = [0, 0], sizes = [8, 1], strides = [1, 1]} : vector<8x8xf32> to vector<8x1xf32>
    %170 = vector.extract_strided_slice %153 {offsets = [0, 0], sizes = [1, 256], strides = [1, 1]} : vector<8x256xf32> to vector<1x256xf32>
    %171 = vector.broadcast %169 : vector<8x1xf32> to vector<8x256xf32>
    %172 = vector.broadcast %170 : vector<1x256xf32> to vector<8x256xf32>
    %173 = arith.mulf %171, %172 : vector<8x256xf32>
    %174 = vector.extract_strided_slice %167 {offsets = [0, 1], sizes = [8, 1], strides = [1, 1]} : vector<8x8xf32> to vector<8x1xf32>
    %175 = vector.extract_strided_slice %153 {offsets = [1, 0], sizes = [1, 256], strides = [1, 1]} : vector<8x256xf32> to vector<1x256xf32>
    %176 = vector.broadcast %174 : vector<8x1xf32> to vector<8x256xf32>
    %177 = vector.broadcast %175 : vector<1x256xf32> to vector<8x256xf32>
    %178 = arith.mulf %176, %177 : vector<8x256xf32>
    %179 = arith.addf %173, %178 : vector<8x256xf32>
    %180 = vector.extract_strided_slice %167 {offsets = [0, 2], sizes = [8, 1], strides = [1, 1]} : vector<8x8xf32> to vector<8x1xf32>
    %181 = vector.extract_strided_slice %153 {offsets = [2, 0], sizes = [1, 256], strides = [1, 1]} : vector<8x256xf32> to vector<1x256xf32>
    %182 = vector.broadcast %180 : vector<8x1xf32> to vector<8x256xf32>
    %183 = vector.broadcast %181 : vector<1x256xf32> to vector<8x256xf32>
    %184 = arith.mulf %182, %183 : vector<8x256xf32>
    %185 = arith.addf %179, %184 : vector<8x256xf32>
    %186 = vector.extract_strided_slice %167 {offsets = [0, 3], sizes = [8, 1], strides = [1, 1]} : vector<8x8xf32> to vector<8x1xf32>
    %187 = vector.extract_strided_slice %153 {offsets = [3, 0], sizes = [1, 256], strides = [1, 1]} : vector<8x256xf32> to vector<1x256xf32>
    %188 = vector.broadcast %186 : vector<8x1xf32> to vector<8x256xf32>
    %189 = vector.broadcast %187 : vector<1x256xf32> to vector<8x256xf32>
    %190 = arith.mulf %188, %189 : vector<8x256xf32>
    %191 = arith.addf %185, %190 : vector<8x256xf32>
    %192 = vector.extract_strided_slice %167 {offsets = [0, 4], sizes = [8, 1], strides = [1, 1]} : vector<8x8xf32> to vector<8x1xf32>
    %193 = vector.extract_strided_slice %153 {offsets = [4, 0], sizes = [1, 256], strides = [1, 1]} : vector<8x256xf32> to vector<1x256xf32>
    %194 = vector.broadcast %192 : vector<8x1xf32> to vector<8x256xf32>
    %195 = vector.broadcast %193 : vector<1x256xf32> to vector<8x256xf32>
    %196 = arith.mulf %194, %195 : vector<8x256xf32>
    %197 = arith.addf %191, %196 : vector<8x256xf32>
    %198 = vector.extract_strided_slice %167 {offsets = [0, 5], sizes = [8, 1], strides = [1, 1]} : vector<8x8xf32> to vector<8x1xf32>
    %199 = vector.extract_strided_slice %153 {offsets = [5, 0], sizes = [1, 256], strides = [1, 1]} : vector<8x256xf32> to vector<1x256xf32>
    %200 = vector.broadcast %198 : vector<8x1xf32> to vector<8x256xf32>
    %201 = vector.broadcast %199 : vector<1x256xf32> to vector<8x256xf32>
    %202 = arith.mulf %200, %201 : vector<8x256xf32>
    %203 = arith.addf %197, %202 : vector<8x256xf32>
    %204 = vector.extract_strided_slice %167 {offsets = [0, 6], sizes = [8, 1], strides = [1, 1]} : vector<8x8xf32> to vector<8x1xf32>
    %205 = vector.extract_strided_slice %153 {offsets = [6, 0], sizes = [1, 256], strides = [1, 1]} : vector<8x256xf32> to vector<1x256xf32>
    %206 = vector.broadcast %204 : vector<8x1xf32> to vector<8x256xf32>
    %207 = vector.broadcast %205 : vector<1x256xf32> to vector<8x256xf32>
    %208 = arith.mulf %206, %207 : vector<8x256xf32>
    %209 = arith.addf %203, %208 : vector<8x256xf32>
    %210 = vector.extract_strided_slice %167 {offsets = [0, 7], sizes = [8, 1], strides = [1, 1]} : vector<8x8xf32> to vector<8x1xf32>
    %211 = vector.extract_strided_slice %153 {offsets = [7, 0], sizes = [1, 256], strides = [1, 1]} : vector<8x256xf32> to vector<1x256xf32>
    %212 = vector.broadcast %210 : vector<8x1xf32> to vector<8x256xf32>
    %213 = vector.broadcast %211 : vector<1x256xf32> to vector<8x256xf32>
    %214 = arith.mulf %212, %213 : vector<8x256xf32>
    %215 = arith.addf %209, %214 : vector<8x256xf32>
    %216 = vector.extract_strided_slice %168 {offsets = [0, 0], sizes = [8, 1], strides = [1, 1]} : vector<8x8xf32> to vector<8x1xf32>
    %217 = vector.extract_strided_slice %166 {offsets = [0, 0], sizes = [1, 256], strides = [1, 1]} : vector<8x256xf32> to vector<1x256xf32>
    %218 = vector.broadcast %216 : vector<8x1xf32> to vector<8x256xf32>
    %219 = vector.broadcast %217 : vector<1x256xf32> to vector<8x256xf32>
    %220 = arith.mulf %218, %219 : vector<8x256xf32>
    %221 = arith.addf %215, %220 : vector<8x256xf32>
    %222 = vector.extract_strided_slice %168 {offsets = [0, 1], sizes = [8, 1], strides = [1, 1]} : vector<8x8xf32> to vector<8x1xf32>
    %223 = vector.extract_strided_slice %166 {offsets = [1, 0], sizes = [1, 256], strides = [1, 1]} : vector<8x256xf32> to vector<1x256xf32>
    %224 = vector.broadcast %222 : vector<8x1xf32> to vector<8x256xf32>
    %225 = vector.broadcast %223 : vector<1x256xf32> to vector<8x256xf32>
    %226 = arith.mulf %224, %225 : vector<8x256xf32>
    %227 = arith.addf %221, %226 : vector<8x256xf32>
    %228 = vector.extract_strided_slice %168 {offsets = [0, 2], sizes = [8, 1], strides = [1, 1]} : vector<8x8xf32> to vector<8x1xf32>
    %229 = vector.extract_strided_slice %166 {offsets = [2, 0], sizes = [1, 256], strides = [1, 1]} : vector<8x256xf32> to vector<1x256xf32>
    %230 = vector.broadcast %228 : vector<8x1xf32> to vector<8x256xf32>
    %231 = vector.broadcast %229 : vector<1x256xf32> to vector<8x256xf32>
    %232 = arith.mulf %230, %231 : vector<8x256xf32>
    %233 = arith.addf %227, %232 : vector<8x256xf32>
    %234 = vector.extract_strided_slice %168 {offsets = [0, 3], sizes = [8, 1], strides = [1, 1]} : vector<8x8xf32> to vector<8x1xf32>
    %235 = vector.extract_strided_slice %166 {offsets = [3, 0], sizes = [1, 256], strides = [1, 1]} : vector<8x256xf32> to vector<1x256xf32>
    %236 = vector.broadcast %234 : vector<8x1xf32> to vector<8x256xf32>
    %237 = vector.broadcast %235 : vector<1x256xf32> to vector<8x256xf32>
    %238 = arith.mulf %236, %237 : vector<8x256xf32>
    %239 = arith.addf %233, %238 : vector<8x256xf32>
    %240 = vector.extract_strided_slice %168 {offsets = [0, 4], sizes = [8, 1], strides = [1, 1]} : vector<8x8xf32> to vector<8x1xf32>
    %241 = vector.extract_strided_slice %166 {offsets = [4, 0], sizes = [1, 256], strides = [1, 1]} : vector<8x256xf32> to vector<1x256xf32>
    %242 = vector.broadcast %240 : vector<8x1xf32> to vector<8x256xf32>
    %243 = vector.broadcast %241 : vector<1x256xf32> to vector<8x256xf32>
    %244 = arith.mulf %242, %243 : vector<8x256xf32>
    %245 = arith.addf %239, %244 : vector<8x256xf32>
    %246 = vector.extract_strided_slice %168 {offsets = [0, 5], sizes = [8, 1], strides = [1, 1]} : vector<8x8xf32> to vector<8x1xf32>
    %247 = vector.extract_strided_slice %166 {offsets = [5, 0], sizes = [1, 256], strides = [1, 1]} : vector<8x256xf32> to vector<1x256xf32>
    %248 = vector.broadcast %246 : vector<8x1xf32> to vector<8x256xf32>
    %249 = vector.broadcast %247 : vector<1x256xf32> to vector<8x256xf32>
    %250 = arith.mulf %248, %249 : vector<8x256xf32>
    %251 = arith.addf %245, %250 : vector<8x256xf32>
    %252 = vector.extract_strided_slice %168 {offsets = [0, 6], sizes = [8, 1], strides = [1, 1]} : vector<8x8xf32> to vector<8x1xf32>
    %253 = vector.extract_strided_slice %166 {offsets = [6, 0], sizes = [1, 256], strides = [1, 1]} : vector<8x256xf32> to vector<1x256xf32>
    %254 = vector.broadcast %252 : vector<8x1xf32> to vector<8x256xf32>
    %255 = vector.broadcast %253 : vector<1x256xf32> to vector<8x256xf32>
    %256 = arith.mulf %254, %255 : vector<8x256xf32>
    %257 = arith.addf %251, %256 : vector<8x256xf32>
    %258 = vector.extract_strided_slice %168 {offsets = [0, 7], sizes = [8, 1], strides = [1, 1]} : vector<8x8xf32> to vector<8x1xf32>
    %259 = vector.extract_strided_slice %166 {offsets = [7, 0], sizes = [1, 256], strides = [1, 1]} : vector<8x256xf32> to vector<1x256xf32>
    %260 = vector.broadcast %258 : vector<8x1xf32> to vector<8x256xf32>
    %261 = vector.broadcast %259 : vector<1x256xf32> to vector<8x256xf32>
    %262 = arith.mulf %260, %261 : vector<8x256xf32>
    %263 = arith.addf %257, %262 : vector<8x256xf32>
    %264 = vector.broadcast %10 : vector<8x1xf32> to vector<8x256xf32>
    %265 = arith.addf %263, %264 : vector<8x256xf32>
    %266 = vector.broadcast %23 : vector<1x256xf32> to vector<8x256xf32>
    %267 = arith.mulf %265, %266 : vector<8x256xf32>
    %268 = vector.broadcast %19 : vector<1x256xf32> to vector<8x256xf32>
    %269 = arith.mulf %265, %268 : vector<8x256xf32>
    %c17_i32_20 = arith.constant 17 : i32
    %270 = tpu.dynamic_rotate %267 by %c17_i32_20 dim 1 : vector<8x256xf32>, i32 -> vector<8x256xf32>
    %271 = vector.extract_strided_slice %7 {offsets = [0, 0], sizes = [8, 1], strides = [1, 1]} : vector<8x9xf32> to vector<8x1xf32>
    %272 = vector.broadcast %271 : vector<8x1xf32> to vector<8x256xf32>
    %273 = arith.mulf %270, %272 : vector<8x256xf32>
    %c16_i32_21 = arith.constant 16 : i32
    %274 = tpu.dynamic_rotate %265 by %c16_i32_21 dim 1 : vector<8x256xf32>, i32 -> vector<8x256xf32>
    %275 = vector.extract_strided_slice %7 {offsets = [0, 1], sizes = [8, 1], strides = [1, 1]} : vector<8x9xf32> to vector<8x1xf32>
    %276 = vector.broadcast %275 : vector<8x1xf32> to vector<8x256xf32>
    %277 = arith.mulf %274, %276 : vector<8x256xf32>
    %278 = arith.addf %273, %277 : vector<8x256xf32>
    %c15_i32_22 = arith.constant 15 : i32
    %279 = tpu.dynamic_rotate %269 by %c15_i32_22 dim 1 : vector<8x256xf32>, i32 -> vector<8x256xf32>
    %280 = vector.extract_strided_slice %7 {offsets = [0, 2], sizes = [8, 1], strides = [1, 1]} : vector<8x9xf32> to vector<8x1xf32>
    %281 = vector.broadcast %280 : vector<8x1xf32> to vector<8x256xf32>
    %282 = arith.mulf %279, %281 : vector<8x256xf32>
    %283 = arith.addf %278, %282 : vector<8x256xf32>
    %284 = vector.broadcast %27 : vector<1x256xf32> to vector<8x256xf32>
    %285 = arith.mulf %283, %284 : vector<8x256xf32>
    %c1_i32_23 = arith.constant 1 : i32
    %286 = tpu.dynamic_rotate %267 by %c1_i32_23 dim 1 : vector<8x256xf32>, i32 -> vector<8x256xf32>
    %287 = vector.extract_strided_slice %7 {offsets = [0, 3], sizes = [8, 1], strides = [1, 1]} : vector<8x9xf32> to vector<8x1xf32>
    %288 = vector.broadcast %287 : vector<8x1xf32> to vector<8x256xf32>
    %289 = arith.mulf %286, %288 : vector<8x256xf32>
    %290 = vector.extract_strided_slice %7 {offsets = [0, 4], sizes = [8, 1], strides = [1, 1]} : vector<8x9xf32> to vector<8x1xf32>
    %291 = vector.broadcast %290 : vector<8x1xf32> to vector<8x256xf32>
    %292 = arith.mulf %265, %291 : vector<8x256xf32>
    %293 = arith.addf %289, %292 : vector<8x256xf32>
    %c255_i32_24 = arith.constant 255 : i32
    %294 = tpu.dynamic_rotate %269 by %c255_i32_24 dim 1 : vector<8x256xf32>, i32 -> vector<8x256xf32>
    %295 = vector.extract_strided_slice %7 {offsets = [0, 5], sizes = [8, 1], strides = [1, 1]} : vector<8x9xf32> to vector<8x1xf32>
    %296 = vector.broadcast %295 : vector<8x1xf32> to vector<8x256xf32>
    %297 = arith.mulf %294, %296 : vector<8x256xf32>
    %298 = arith.addf %293, %297 : vector<8x256xf32>
    %299 = arith.addf %285, %298 : vector<8x256xf32>
    %c241_i32_25 = arith.constant 241 : i32
    %300 = tpu.dynamic_rotate %267 by %c241_i32_25 dim 1 : vector<8x256xf32>, i32 -> vector<8x256xf32>
    %301 = vector.extract_strided_slice %7 {offsets = [0, 6], sizes = [8, 1], strides = [1, 1]} : vector<8x9xf32> to vector<8x1xf32>
    %302 = vector.broadcast %301 : vector<8x1xf32> to vector<8x256xf32>
    %303 = arith.mulf %300, %302 : vector<8x256xf32>
    %c240_i32_26 = arith.constant 240 : i32
    %304 = tpu.dynamic_rotate %265 by %c240_i32_26 dim 1 : vector<8x256xf32>, i32 -> vector<8x256xf32>
    %305 = vector.extract_strided_slice %7 {offsets = [0, 7], sizes = [8, 1], strides = [1, 1]} : vector<8x9xf32> to vector<8x1xf32>
    %306 = vector.broadcast %305 : vector<8x1xf32> to vector<8x256xf32>
    %307 = arith.mulf %304, %306 : vector<8x256xf32>
    %308 = arith.addf %303, %307 : vector<8x256xf32>
    %c239_i32_27 = arith.constant 239 : i32
    %309 = tpu.dynamic_rotate %269 by %c239_i32_27 dim 1 : vector<8x256xf32>, i32 -> vector<8x256xf32>
    %310 = vector.extract_strided_slice %7 {offsets = [0, 8], sizes = [8, 1], strides = [1, 1]} : vector<8x9xf32> to vector<8x1xf32>
    %311 = vector.broadcast %310 : vector<8x1xf32> to vector<8x256xf32>
    %312 = arith.mulf %309, %311 : vector<8x256xf32>
    %313 = arith.addf %308, %312 : vector<8x256xf32>
    %314 = vector.broadcast %36 : vector<1x256xf32> to vector<8x256xf32>
    %315 = arith.mulf %313, %314 : vector<8x256xf32>
    %316 = arith.addf %299, %315 : vector<8x256xf32>
    %317 = vector.broadcast %9 : vector<8x1xf32> to vector<8x256xf32>
    %318 = arith.addf %316, %317 : vector<8x256xf32>
    %cst_28 = arith.constant 5.000000e-01 : f32
    %319 = vector.broadcast %cst_28 : f32 to vector<8x256xf32>
    %320 = arith.mulf %319, %265 : vector<8x256xf32>
    %cst_29 = arith.constant 4.471500e-02 : f32
    %321 = vector.broadcast %cst_29 : f32 to vector<8x256xf32>
    %322 = arith.mulf %321, %265 : vector<8x256xf32>
    %323 = arith.mulf %322, %265 : vector<8x256xf32>
    %324 = arith.mulf %323, %265 : vector<8x256xf32>
    %325 = arith.addf %265, %324 : vector<8x256xf32>
    %cst_30 = arith.constant 0.797884583 : f32
    %326 = vector.broadcast %cst_30 : f32 to vector<8x256xf32>
    %327 = arith.mulf %326, %325 : vector<8x256xf32>
    %328 = math.tanh %327 : vector<8x256xf32>
    %cst_31 = arith.constant 1.000000e+00 : f32
    %329 = vector.broadcast %cst_31 : f32 to vector<8x256xf32>
    %330 = arith.addf %329, %328 : vector<8x256xf32>
    %331 = arith.mulf %320, %330 : vector<8x256xf32>
    %cst_32 = arith.constant 5.000000e-01 : f32
    %332 = vector.broadcast %cst_32 : f32 to vector<8x256xf32>
    %333 = arith.mulf %332, %318 : vector<8x256xf32>
    %cst_33 = arith.constant 4.471500e-02 : f32
    %334 = vector.broadcast %cst_33 : f32 to vector<8x256xf32>
    %335 = arith.mulf %334, %318 : vector<8x256xf32>
    %336 = arith.mulf %335, %318 : vector<8x256xf32>
    %337 = arith.mulf %336, %318 : vector<8x256xf32>
    %338 = arith.addf %318, %337 : vector<8x256xf32>
    %cst_34 = arith.constant 0.797884583 : f32
    %339 = vector.broadcast %cst_34 : f32 to vector<8x256xf32>
    %340 = arith.mulf %339, %338 : vector<8x256xf32>
    %341 = math.tanh %340 : vector<8x256xf32>
    %cst_35 = arith.constant 1.000000e+00 : f32
    %342 = vector.broadcast %cst_35 : f32 to vector<8x256xf32>
    %343 = arith.addf %342, %341 : vector<8x256xf32>
    %344 = arith.mulf %333, %343 : vector<8x256xf32>
    %345 = vector.broadcast %11 : vector<8x1xf32> to vector<8x256xf32>
    %346 = arith.mulf %87, %345 : vector<8x256xf32>
    %347 = vector.broadcast %12 : vector<8x1xf32> to vector<8x256xf32>
    %348 = arith.addf %346, %347 : vector<8x256xf32>
    %349 = arith.addf %331, %87 : vector<8x256xf32>
    %350 = arith.addf %344, %348 : vector<8x256xf32>
    %351 = vector.extract_strided_slice %349 {offsets = [0, 0], sizes = [4, 256], strides = [1, 1]} : vector<8x256xf32> to vector<4x256xf32>
    %c0_36 = arith.constant 0 : index
    %c0_37 = arith.constant 0 : index
    %c0_38 = arith.constant 0 : index
    %352 = vector.load %arg5[%c0_36, %c0_37, %c0_38] : memref<1x16x256xf32, #tpu.memory_space<vmem>>, vector<1x4x256xf32>
    %353 = vector.shape_cast %352 : vector<1x4x256xf32> to vector<4x256xf32>
    %354 = vector.shape_cast %351 : vector<4x256xf32> to vector<1x4x256xf32>
    tpu.vector_store %arg5[%c0_36, %c0_37, %c0_38], %354 {strides = array<i32>} : memref<1x16x256xf32, #tpu.memory_space<vmem>>, vector<1x4x256xf32>,
    %355 = vector.extract_strided_slice %350 {offsets = [0, 0], sizes = [4, 256], strides = [1, 1]} : vector<8x256xf32> to vector<4x256xf32>
    %c0_39 = arith.constant 0 : index
    %c4 = arith.constant 4 : index
    %c0_40 = arith.constant 0 : index
    %356 = vector.load %arg5[%c0_39, %c4, %c0_40] : memref<1x16x256xf32, #tpu.memory_space<vmem>>, vector<1x4x256xf32>
    %357 = vector.shape_cast %356 : vector<1x4x256xf32> to vector<4x256xf32>
    %358 = vector.shape_cast %355 : vector<4x256xf32> to vector<1x4x256xf32>
    tpu.vector_store %arg5[%c0_39, %c4, %c0_40], %358 {strides = array<i32>} : memref<1x16x256xf32, #tpu.memory_space<vmem>>, vector<1x4x256xf32>,
    %359 = vector.extract_strided_slice %349 {offsets = [4, 0], sizes = [4, 256], strides = [1, 1]} : vector<8x256xf32> to vector<4x256xf32>
    %c0_41 = arith.constant 0 : index
    %c8 = arith.constant 8 : index
    %c0_42 = arith.constant 0 : index
    %360 = vector.load %arg5[%c0_41, %c8, %c0_42] : memref<1x16x256xf32, #tpu.memory_space<vmem>>, vector<1x4x256xf32>
    %361 = vector.shape_cast %360 : vector<1x4x256xf32> to vector<4x256xf32>
    %362 = vector.shape_cast %359 : vector<4x256xf32> to vector<1x4x256xf32>
    tpu.vector_store %arg5[%c0_41, %c8, %c0_42], %362 {strides = array<i32>} : memref<1x16x256xf32, #tpu.memory_space<vmem>>, vector<1x4x256xf32>,
    %363 = vector.extract_strided_slice %350 {offsets = [4, 0], sizes = [4, 256], strides = [1, 1]} : vector<8x256xf32> to vector<4x256xf32>
    %c0_43 = arith.constant 0 : index
    %c12 = arith.constant 12 : index
    %c0_44 = arith.constant 0 : index
    %364 = vector.load %arg5[%c0_43, %c12, %c0_44] : memref<1x16x256xf32, #tpu.memory_space<vmem>>, vector<1x4x256xf32>
    %365 = vector.shape_cast %364 : vector<1x4x256xf32> to vector<4x256xf32>
    %366 = vector.shape_cast %363 : vector<4x256xf32> to vector<1x4x256xf32>
    tpu.vector_store %arg5[%c0_43, %c12, %c0_44], %366 {strides = array<i32>} : memref<1x16x256xf32, #tpu.memory_space<vmem>>, vector<1x4x256xf32>,
    return
  }
  func.func @transform_0(%arg0: i32) -> (i32, i32, i32) {
    %c0_i32 = arith.constant 0 : i32
    %c0_i32_0 = arith.constant 0 : i32
    %c0_i32_1 = arith.constant 0 : i32
    return %arg0, %c0_i32, %c0_i32_0 : i32, i32, i32
  }
  func.func @transform_1(%arg0: i32) -> (i32, i32) {
    %c0_i32 = arith.constant 0 : i32
    %c0_i32_0 = arith.constant 0 : i32
    %c0_i32_1 = arith.constant 0 : i32
    return %c0_i32, %c0_i32_0 : i32, i32
  }
  func.func @transform_2(%arg0: i32) -> (i32, i32) {
    %c0_i32 = arith.constant 0 : i32
    %c0_i32_0 = arith.constant 0 : i32
    %c0_i32_1 = arith.constant 0 : i32
    return %c0_i32, %c0_i32_0 : i32, i32
  }
  func.func @transform_3(%arg0: i32) -> (i32, i32) {
    %c0_i32 = arith.constant 0 : i32
    %c0_i32_0 = arith.constant 0 : i32
    %c0_i32_1 = arith.constant 0 : i32
    return %c0_i32, %c0_i32_0 : i32, i32
  }
  func.func @transform_4(%arg0: i32) -> (i32, i32, i32) {
    %c0_i32 = arith.constant 0 : i32
    %c0_i32_0 = arith.constant 0 : i32
    %c0_i32_1 = arith.constant 0 : i32
    return %arg0, %c0_i32, %c0_i32_0 : i32, i32, i32
  }
}

</mosaic_0001>

<bundles_post_ra>
// kernel: tpu_custom_call.1
= control target key start
LH: loop header
LB: loop body
LE: loop exit
PB: predicated region body
PF: predicated region fallthrough
CT: control target
= control target key end

     0   :  { %9 = vsyncpa [#allocation3], 0  ;;  %s1419_s0 = inlined_call_operand.vmem [shape: f32[1,8,256], index: 0, kind: input, shape index: {}]   ;;  %s1420_s1 = inlined_call_operand.vmem [shape: f32[16,8], index: 1, kind: input, shape index: {}]   ;;  %s1421_s2 = inlined_call_operand.vmem [shape: f32[8,16], index: 2, kind: input, shape index: {}]   ;;  %s1422_s3 = inlined_call_operand.hbm [shape: f32[16,13], index: 3, kind: input, shape index: {}]   ;;  %s1423_s4 = inlined_call_operand.hbm [shape: f32[1,16,256], index: 4, kind: output, shape index: {}]  }
   0x1   :  { %10 = vsyncpa [#allocation4], 0  ;;  %s21_s17 = sshll.u32 %s1422_s3, 4  ;;  %s952_s18 = smov [#allocation2]   ;;  %s22_s17 = int_to_ptr.hbm [resolvable:$true] %s21_s17 }
   0x2   :  { %s23_s19 = sshll.u32 %s952_s18, 4  ;;  %s953_s20 = smov 128   ;;  %s24_s19 = int_to_ptr.vmem [resolvable:$true] %s23_s19 }
   0x3   :  { %s954_s21 = smov 8  }
   0x4   :  { %29 = dma.hbm_to_vmem [thread:$0]  %s22_s17, 256, %s24_s19, [#allocation3], %s953_s20, %s953_s20, %s954_s21  }
   0x5   :  { %948 = dma.done.wait [#allocation3], 256  }
   0x6   :  { %949 = vsyncadd [#allocation3], 4294967040  ;;  %v955_v0 = vmov 3   ;;  %v956_v1 = vmov 2   ;;  %v957_v2 = vmov 1   ;;  %v36_v3 = vld [vmem:[%s1420_s1] sm:$0xff] }
   0x7   :  { %834 = vset.pattern.permute.xlu0 %v955_v0  ;;  %833 = vset.pattern.permute.xlu2 %v956_v1  ;;  %v37_v4 = vld [vmem:[%s1420_s1 + $0x8] sm:$0xff]  ;;  %v958_v5 = vmov 0   ;;  %v959_v6 = vmov 4   ;;  %v1021_v7 = vld [vmem:[#allocation2] sm:$0xff]  ;;  %v960_v8 = vmov 5   ;;  %v961_v10 = vmov 6  }
   0x8   :  { %832 = vset.pattern.permute.xlu1 %v957_v2  ;;  %129 = vperm.xlu0 %834, %v36_v3   ;;  %v1029_v9 = vld [vmem:[%s1421_s2] sm:$0xff]  ;;  %v962_v11 = vmov 7   ;;  %v1038_v12 = vld [vmem:[#allocation2 + $0x8] sm:$0xff]  ;;  %v963_v13 = vmov 8   ;;  %v964_v14 = vmov 10   ;;  %v965_v15 = vmov 9  }
   0x9   :  { %111 = vperm.xlu2 %833, %v36_v3   ;;  %93 = vperm.xlu1 %832, %v36_v3   ;;  %v1062_v17 = vld [vmem:[%s1419_s0] sm:$0xff]  ;;  %v1067_v18 = vld [vmem:[%s1419_s0 + $0x8] sm:$0xff]  ;;  %s966_s0 = smov 16   ;;  %s967_s29 = smov 112  }
   0xa   :  { %v118_v19 = vperm.slane %v1062_v17, 2  ;;  %v119_v20 = vperm.slane %v1067_v18, 2  ;;  %v100_v28 = vperm.slane %v1062_v17, 1  ;;  %v101_v29 = vperm.slane %v1067_v18, 1  ;;  %s969_s30 = smov 17   ;;  %s970_s5 = smov 15  }
   0xb   :  { %v190_v34 = vperm.slane %v1062_v17, 6  ;;  %v191_v35 = vperm.slane %v1067_v18, 6  ;;  %v86_v39 = vperm.slane %v1062_v17, 0  ;;  %v87_v40 = vperm.slane %v1067_v18, 0  ;;  %s971_s6 = smov 127   ;;  %s972_s7 = smov 1  }
   0xc   :  { %v136_v41 = vperm.slane %v1062_v17, 3  ;;  %v137_v42 = vperm.slane %v1067_v18, 3  ;;  %v208_v51 = vperm.slane %v1062_v17, 7  ;;  %v209_v52 = vperm.slane %v1067_v18, 7  ;;  %s973_s8 = smov 113   ;;  %s974_s9 = smov 111  }
   0xd   :  { %s783_s12 = sshll.u32 %s1423_s4, 4  ;;  %s980_s13 = smov [#allocation5]   ;;  %s784_s12 = int_to_ptr.hbm [resolvable:$true] %s783_s12 }
   0xe   :  { %s781_s14 = sshll.u32 %s980_s13, 4  ;;  %s981_s15 = smov 256   ;;  %s782_s14 = int_to_ptr.vmem [resolvable:$true] %s781_s14 }
  0x10   :  { %835 = vset.pattern.permute.xlu0 %v958_v5 }
  0x11   :  { %115 = vperm.xlu2 %833, %v37_v4   ;;  %97 = vperm.xlu1 %832, %v37_v4  }
  0x12   :  { %78 = vperm.xlu0 %835, %v36_v3  }
  0x19   :  { %837 = vset.pattern.permute.xlu2 %v959_v6  ;;  %836 = vset.pattern.permute.xlu1 %v955_v0 }
  0x1a   :  { %83 = vperm.xlu0 %835, %v37_v4   ;;  %147 = vperm.xlu2 %837, %v36_v3  }
  0x1b   :  { %133 = vperm.xlu1 %836, %v37_v4  }
  0x22   :  { %220 = vperm.xlu0 %835, %v1021_v7   ;;  %839 = vset.pattern.permute.xlu2 %v960_v8 }
  0x23   :  { %838 = vset.pattern.permute.xlu1 %v959_v6  ;;  %165 = vperm.xlu2 %839, %v36_v3  }
  0x24   :  { %151 = vperm.xlu1 %838, %v37_v4  }
  0x2a   :  { %410 = vperm.xlu0 %835, %v1029_v9  }
  0x2b   :  { %841 = vset.pattern.permute.xlu2 %v961_v10 }
  0x2c   :  { %840 = vset.pattern.permute.xlu1 %v961_v10  ;;  %187 = vperm.xlu2 %841, %v37_v4  }
  0x2d   :  { %183 = vperm.xlu1 %840, %v36_v3  }
  0x32   :  { %854 = vset.pattern.permute.xlu0 %v960_v8 }
  0x33   :  { %169 = vperm.xlu0 %854, %v37_v4  }
  0x34   :  { %843 = vset.pattern.permute.xlu2 %v962_v11 }
  0x35   :  { %842 = vset.pattern.permute.xlu1 %v962_v11  ;;  %205 = vperm.xlu2 %843, %v37_v4   ;;  %v154_v4 = vperm.slane %v1062_v17, 4 }
  0x36   :  { %201 = vperm.xlu1 %842, %v36_v3  }
  0x3b   :  { %295 = vperm.xlu0 %854, %v1021_v7  }
  0x3d   :  { %845 = vset.pattern.permute.xlu2 %v957_v2 }
  0x3e   :  { %844 = vset.pattern.permute.xlu1 %v958_v5  ;;  %244 = vperm.xlu2 %845, %v1021_v7   ;;  %v155_v5 = vperm.slane %v1067_v18, 4 }
  0x3f   :  { %225 = vperm.xlu1 %844, %v1038_v12  }
  0x46   :  { %846 = vset.pattern.permute.xlu2 %v956_v1 }
  0x47   :  { %849 = vset.pattern.permute.xlu1 %v961_v10  ;;  %257 = vperm.xlu2 %846, %v1021_v7  }
  0x48   :  { %310 = vperm.xlu1 %849, %v1021_v7  }
  0x4f   :  { %847 = vset.pattern.permute.xlu2 %v955_v0 }
  0x50   :  { %850 = vset.pattern.permute.xlu1 %v962_v11  ;;  %272 = vperm.xlu2 %847, %v1021_v7  }
  0x51   :  { %327 = vperm.xlu1 %850, %v1021_v7  }
  0x58   :  { %848 = vset.pattern.permute.xlu2 %v959_v6 }
  0x59   :  { %851 = vset.pattern.permute.xlu1 %v963_v13  ;;  %289 = vperm.xlu2 %848, %v1021_v7  }
  0x5a   :  { %340 = vperm.xlu1 %851, %v1021_v7  }
  0x61   :  { %853 = vset.pattern.permute.xlu2 %v964_v14 }
  0x62   :  { %852 = vset.pattern.permute.xlu1 %v965_v15  ;;  %367 = vperm.xlu2 %853, %v1021_v7  }
  0x63   :  { %355 = vperm.xlu1 %852, %v1021_v7   ;;  %v112_v16 = vpop.permute.xlu2 %111 }
  0x6a   :  { %856 = vset.pattern.permute.xlu2 %v956_v1 }
  0x6b   :  { %855 = vset.pattern.permute.xlu1 %v957_v2  ;;  %v116_v21 = vpop.permute.xlu2 %115  ;;  %428 = vperm.xlu2 %856, %v1029_v9  }
  0x6c   :  { %418 = vperm.xlu1 %855, %v1029_v9   ;;  %v122_v22 = vmul.f32 %v118_v19, %v116_v21  ;;  %v123_v23 = vmul.f32 %v119_v20, %v116_v21  ;;  %v120_v21 = vmul.f32 %v118_v19, %v112_v16  ;;  %v172_v19 = vperm.slane %v1062_v17, 5 }
  0x73   :  { %858 = vset.pattern.permute.xlu2 %v959_v6 }
  0x74   :  { %857 = vset.pattern.permute.xlu1 %v955_v0  ;;  %448 = vperm.xlu2 %858, %v1029_v9   ;;  %v1079_v24 = vpop.permute.xlu2 %147 }
  0x75   :  { %438 = vperm.xlu1 %857, %v1029_v9  }
  0x7a   :  { %v130_v25 = vpop.permute.xlu0 %129 }
  0x7b   :  { %v94_v26 = vpop.permute.xlu1 %93 }
  0x7c   :  { %860 = vset.pattern.permute.xlu2 %v962_v11  ;;  %v102_v63 = vmul.f32 %v100_v28, %v94_v26  ;;  %v103_v3 = vmul.f32 %v101_v29, %v94_v26 }
  0x7d   :  { %859 = vset.pattern.permute.xlu1 %v961_v10  ;;  %v1083_v27 = vpop.permute.xlu2 %165 }
  0x83   :  { %v98_v30 = vpop.permute.xlu1 %97 }
  0x84   :  { %v79_v31 = vpop.permute.xlu0 %78  ;;  %v104_v32 = vmul.f32 %v100_v28, %v98_v30  ;;  %v105_v33 = vmul.f32 %v101_v29, %v98_v30  ;;  %v121_v30 = vmul.f32 %v119_v20, %v112_v16  ;;  %v156_v29 = vmul.f32 %v154_v4, %v1079_v24 }
  0x85   :  { %v88_v58 = vmul.f32 %v86_v39, %v79_v31  ;;  %v89_v59 = vmul.f32 %v87_v40, %v79_v31  ;;  %v138_v31 = vmul.f32 %v136_v41, %v130_v25  ;;  %v173_v16 = vperm.slane %v1067_v18, 5 }
  0x86   :  { %v188_v36 = vpop.permute.xlu2 %187  ;;  %v157_v20 = vmul.f32 %v155_v5, %v1079_v24 }
  0x87   :  { %v1089_v37 = vmul.f32 %v190_v34, %v188_v36  ;;  %v1091_v38 = vmul.f32 %v191_v35, %v188_v36  ;;  %v107_v36 = vadd.f32 %v103_v3, %v89_v59 }
  0x89   :  { %v125_v28 = vadd.f32 %v121_v30, %v107_v36 }
  0x8c   :  { %v84_v43 = vpop.permute.xlu0 %83 }
  0x8d   :  { %v90_v44 = vmul.f32 %v86_v39, %v84_v43  ;;  %v91_v45 = vmul.f32 %v87_v40, %v84_v43  ;;  %v134_v46 = vpop.permute.xlu1 %133  ;;  %v139_v40 = vmul.f32 %v137_v42, %v130_v25 }
  0x8e   :  { %v140_v47 = vmul.f32 %v136_v41, %v134_v46  ;;  %v141_v48 = vmul.f32 %v137_v42, %v134_v46 }
  0x8f   :  { %v108_v49 = vadd.f32 %v104_v32, %v90_v44  ;;  %v109_v50 = vadd.f32 %v105_v33, %v91_v45  ;;  %v206_v53 = vpop.permute.xlu2 %205  ;;  %v106_v33 = vadd.f32 %v102_v63, %v88_v58 }
  0x90   :  { %v212_v56 = vmul.f32 %v208_v51, %v206_v53  ;;  %v213_v57 = vmul.f32 %v209_v52, %v206_v53  ;;  %v175_v53 = vmul.f32 %v173_v16, %v1083_v27 }
  0x91   :  { %v126_v54 = vadd.f32 %v122_v22, %v108_v49  ;;  %v127_v55 = vadd.f32 %v123_v23, %v109_v50  ;;  %v124_v45 = vadd.f32 %v120_v21, %v106_v33  ;;  %v41_v49 = vlaneseq }
  0x92   :  { %v174_v50 = vmul.f32 %v172_v19, %v1083_v27 }
  0x93   :  { %v144_v60 = vadd.f32 %v140_v47, %v126_v54  ;;  %v145_v61 = vadd.f32 %v141_v48, %v127_v55  ;;  %v142_v46 = vadd.f32 %v138_v31, %v124_v45  ;;  %v143_v47 = vadd.f32 %v139_v40, %v125_v28 }
  0x94   :  { %v221_v62 = vpop.permute.xlu0 %220  ;;  %v1113_v54 = vand.u32 127, %v41_v49 }
  0x95   :  { %v160_v25 = vadd.f32 %v156_v29, %v142_v46  ;;  %v161_v42 = vadd.f32 %v157_v20, %v143_v47 }
  0x96   :  { %v152_v32 = vpop.permute.xlu1 %151  ;;  %vm240_vm4 = vcmp.lt.s32.totalorder %v1113_v54, 17  ;;  %vm253_vm5 = vcmp.lt.s32.totalorder %v1113_v54, 16  ;;  %vm268_vm6 = vcmp.lt.s32.totalorder %v1113_v54, 15  ;;  %vm285_vm7 = vcmp.lt.s32.totalorder %v1113_v54, 1 }
  0x97   :  { %v158_v22 = vmul.f32 %v154_v4, %v152_v32  ;;  %v159_v23 = vmul.f32 %v155_v5, %v152_v32  ;;  %v178_v24 = vadd.f32 %v174_v50, %v160_v25  ;;  %vm58_vm8 = vcmp.ge.s32.totalorder %v1113_v54, 16 }
  0x98   :  { %v1101_v39 = vpop.permute.xlu2 %244  ;;  %vm306_vm9 = vcmp.lt.s32.totalorder %v1113_v54, 127  ;;  %vm336_vm10 = vcmp.lt.s32.totalorder %v1113_v54, 112  ;;  %vm323_vm11 = vcmp.lt.s32.totalorder %v1113_v54, 113  ;;  %vm351_vm13 = vcmp.lt.s32.totalorder %v1113_v54, 111 }
  0x99   :  { %v162_v43 = vadd.f32 %v158_v22, %v144_v60  ;;  %v163_v44 = vadd.f32 %v159_v23, %v145_v61  ;;  %v179_v60 = vadd.f32 %v175_v53, %v161_v42  ;;  %v1116_v61 = vadd.s32 128, %v1113_v54 }
  0x9a   :  { %v44_v23 = vand.u32 15, %v1113_v54 }
  0x9b   :  { %v45_v22 = vand.u32 15, %v1116_v61  ;;  %vm65_vm12 = vcmp.ge.s32.totalorder %v1116_v61, 240 }
  0x9c   :  { %v1103_v26 = vpop.permute.xlu0 %410  ;;  %vm52_vm1 = vcmp.ne.s32.totalorder %v44_v23, 15  ;;  %vm46_vm3 = vcmp.ne.s32.totalorder %v44_v23, 0 }
  0x9d   :  { %vm53_vm0 = vcmp.ne.s32.totalorder %v45_v22, 15  ;;  %vm47_vm2 = vcmp.ne.s32.totalorder %v45_v22, 0 }
  0x9f   :  { %v184_v48 = vpop.permute.xlu1 %183 }
  0xa0   :  { %v192_v55 = vmul.f32 %v190_v34, %v184_v48  ;;  %v193_v17 = vmul.f32 %v191_v35, %v184_v48 }
  0xa1   :  { %v1110_v41 = vpop.permute.xlu2 %257 }
  0xa2   :  { %v196_v5 = vadd.f32 %v192_v55, %v178_v24  ;;  %v197_v21 = vadd.f32 %v193_v17, %v179_v60 }
  0xa5   :  { %v170_v58 = vpop.permute.xlu0 %169 }
  0xa6   :  { %v176_v18 = vmul.f32 %v172_v19, %v170_v58  ;;  %v177_v59 = vmul.f32 %v173_v16, %v170_v58 }
  0xa8   :  { %v180_v63 = vadd.f32 %v176_v18, %v162_v43  ;;  %v181_v3 = vadd.f32 %v177_v59, %v163_v44  ;;  %v202_v4 = vpop.permute.xlu1 %201 }
  0xa9   :  { %v210_v30 = vmul.f32 %v208_v51, %v202_v4  ;;  %v211_v32 = vmul.f32 %v209_v52, %v202_v4 }
  0xaa   :  { %v198_v27 = vadd.f32 %v1089_v37, %v180_v63  ;;  %v199_v34 = vadd.f32 %v1091_v38, %v181_v3  ;;  %v1120_v36 = vpop.permute.xlu2 %272 }
  0xab   :  { %v214_v35 = vadd.f32 %v210_v30, %v196_v5  ;;  %v215_v33 = vadd.f32 %v211_v32, %v197_v21 }
  0xac   :  { %v216_v31 = vadd.f32 %v212_v56, %v198_v27  ;;  %v217_v43 = vadd.f32 %v213_v57, %v199_v34  ;;  %v968_v57 = vmov 0.0  }
  0xad   :  { %v1124_v44 = vadd.f32 %v221_v62, %v214_v35  ;;  %v1126_v40 = vadd.f32 %v221_v62, %v215_v33  ;;  %v1141_v62 = vsel %vm53_vm0, 1.0, %v968_v57  ;;  %v1144_v45 = vsel %vm52_vm1, 1.0, %v968_v57 }
  0xae   :  { %v1165_v53 = vsel %vm47_vm2, 1.0, %v968_v57  ;;  %v1168_v55 = vsel %vm46_vm3, 1.0, %v968_v57 }
  0xaf   :  { %251 = vrot.lane.b32.xlu1 %v1126_v40, %s966_s0  ;;  %332 = vrot.lane.b32.xlu2 %v1124_v44, %s967_s29  ;;  %v374_v38 = vmul.f32 0.044715, %v1124_v44  ;;  %v375_v51 = vmul.f32 0.044715, %v1126_v40  ;;  %v233_v16 = vmul.f32 %v1141_v62, %v1126_v40  ;;  %v232_v20 = vmul.f32 %v1144_v45, %v1124_v44 }
  0xb0   :  { %249 = vrot.lane.b32.xlu0 %v1124_v44, %s966_s0  ;;  %v235_v58 = vmul.f32 %v1165_v53, %v1126_v40  ;;  %v234_v18 = vmul.f32 %v1168_v55, %v1124_v44  ;;  %v372_v60 = vmul.f32 0.5, %v1124_v44  ;;  %v373_v3 = vmul.f32 0.5, %v1126_v40 }
  0xb1   :  { %v226_v37 = vpop.permute.xlu1 %225  ;;  %v376_v28 = vmul.f32 %v374_v38, %v1124_v44  ;;  %v377_v29 = vmul.f32 %v375_v51, %v1126_v40 }
  0xb2   :  { %v1136_v52 = vadd.f32 %v226_v37, %v216_v31  ;;  %v1138_v56 = vadd.f32 %v226_v37, %v217_v43 }
  0xb3   :  { %v1148_v19 = vpop.permute.xlu2 %289  ;;  %v378_v46 = vmul.f32 %v376_v28, %v1124_v44  ;;  %v379_v47 = vmul.f32 %v377_v29, %v1126_v40 }
  0xb5   :  { %v380_v48 = vadd.f32 %v378_v46, %v1124_v44  ;;  %v381_v49 = vadd.f32 %v379_v47, %v1126_v40 }
  0xb7   :  { %238 = vrot.lane.b32.xlu1 %v233_v16, %s969_s30  ;;  %236 = vrot.lane.b32.xlu2 %v232_v20, %s969_s30  ;;  %v382_v50 = vmul.f32 0.7978846, %v380_v48  ;;  %v383_v25 = vmul.f32 0.7978846, %v381_v49 }
  0xb8   :  { %334 = vrot.lane.b32.xlu0 %v1126_v40, %s967_s29 }
  0xb9   :  { %883 = vtanh.f32 %v382_v50 }
  0xba   :  { %v1162_v42 = vpop.permute.xlu1 %310  ;;  %885 = vtanh.f32 %v383_v25 }
  0xbc   :  { %v1170_v17 = vpop.permute.xlu2 %367 }
  0xbf   :  { %266 = vrot.lane.b32.xlu1 %v235_v58, %s970_s5  ;;  %304 = vrot.lane.b32.xlu2 %v235_v58, %s971_s6  ;;  %v884_v59 = vpop.eup %883 }
  0xc0   :  { %264 = vrot.lane.b32.xlu0 %v234_v18, %s970_s5  ;;  %v886_v24 = vpop.eup %885  ;;  %v386_v63 = vadd.f32 1.0, %v884_v59 }
  0xc1   :  { %v387_v4 = vadd.f32 1.0, %v886_v24 }
  0xc2   :  { %v1183_v21 = vmul.f32 %v386_v63, %v372_v60 }
  0xc3   :  { %v1181_v5 = vpop.permute.xlu1 %327  ;;  %v1185_v30 = vmul.f32 %v387_v4, %v373_v3  ;;  %v975_v4 = vmov 11  }
  0xc4   :  { %v431_v27 = vperm.slane %v1183_v21, 2  ;;  %v413_v34 = vperm.slane %v1183_v21, 0  ;;  %v451_v38 = vperm.slane %v1183_v21, 4  ;;  %v441_v59 = vperm.slane %v1183_v21, 3 }
  0xc5   :  { %v429_v32 = vpop.permute.xlu2 %428  ;;  %v432_v35 = vperm.slane %v1185_v30, 2  ;;  %v414_v33 = vperm.slane %v1185_v30, 0  ;;  %v452_v51 = vperm.slane %v1185_v30, 4  ;;  %v422_v47 = vperm.slane %v1185_v30, 1 }
  0xc6   :  { %v433_v22 = vmul.f32 %v431_v27, %v429_v32  ;;  %v415_v23 = vmul.f32 %v413_v34, %v1103_v26  ;;  %v442_v24 = vperm.slane %v1185_v30, 3  ;;  %v976_v34 = vmov 12  }
  0xc7   :  { %283 = vrot.lane.b32.xlu1 %v233_v16, %s972_s7  ;;  %319 = vrot.lane.b32.xlu2 %v232_v20, %s973_s8  ;;  %v434_v31 = vmul.f32 %v432_v35, %v429_v32  ;;  %v416_v43 = vmul.f32 %v414_v33, %v1103_v26  ;;  %v421_v26 = vperm.slane %v1183_v21, 1 }
  0xc8   :  { %281 = vrot.lane.b32.xlu0 %v232_v20, %s972_s7 }
  0xcc   :  { %v1196_v37 = vpop.permute.xlu1 %340 }
  0xce   :  { %v449_v28 = vpop.permute.xlu2 %448 }
  0xcf   :  { %302 = vrot.lane.b32.xlu1 %v234_v18, %s971_s6  ;;  %347 = vrot.lane.b32.xlu2 %v234_v18, %s974_s9  ;;  %v453_v29 = vmul.f32 %v451_v38, %v449_v28  ;;  %v454_v46 = vmul.f32 %v452_v51, %v449_v28 }
  0xd0   :  { %321 = vrot.lane.b32.xlu0 %v233_v16, %s973_s8 }
  0xd5   :  { %v1203_v20 = vpop.permute.xlu1 %355 }
  0xd7   :  { %468 = vperm.xlu1 %859, %v1029_v9   ;;  %478 = vperm.xlu2 %860, %v1029_v9  }
  0xd8   :  { %349 = vrot.lane.b32.xlu0 %v235_v58, %s974_s9 }
  0xde   :  { %v419_v48 = vpop.permute.xlu1 %418 }
  0xdf   :  { %v423_v49 = vmul.f32 %v421_v26, %v419_v48  ;;  %v424_v50 = vmul.f32 %v422_v47, %v419_v48  ;;  %861 = vset.pattern.permute.xlu1 %v963_v13  ;;  %862 = vset.pattern.permute.xlu2 %v965_v15  ;;  %v1270_v48 = vsel %vm58_vm8, 1.0, %v968_v57 }
  0xe0   :  { %458 = vperm.xlu0 %854, %v1029_v9   ;;  %488 = vperm.xlu1 %861, %v1029_v9  }
  0xe1   :  { %v425_v16 = vadd.f32 %v423_v49, %v415_v23  ;;  %v426_v25 = vadd.f32 %v424_v50, %v416_v43  ;;  %498 = vperm.xlu2 %862, %v1029_v9   ;;  %v978_v23 = vmov 15  }
  0xe3   :  { %v435_v58 = vadd.f32 %v433_v22, %v425_v16  ;;  %v436_v18 = vadd.f32 %v434_v31, %v426_v25  ;;  %v977_v22 = vmov 13   ;;  %v979_v31 = vmov 14  }
  0xe7   :  { %v439_v60 = vpop.permute.xlu1 %438 }
  0xe8   :  { %v443_v63 = vmul.f32 %v441_v59, %v439_v60  ;;  %v444_v3 = vmul.f32 %v442_v24, %v439_v60  ;;  %864 = vset.pattern.permute.xlu1 %v975_v4  ;;  %863 = vset.pattern.permute.xlu0 %v964_v14 }
  0xe9   :  { %518 = vperm.xlu1 %864, %v1029_v9   ;;  %508 = vperm.xlu0 %863, %v1029_v9  }
  0xea   :  { %v445_v32 = vadd.f32 %v443_v63, %v435_v58  ;;  %v446_v27 = vadd.f32 %v444_v3, %v436_v18  ;;  %865 = vset.pattern.permute.xlu2 %v976_v34 }
  0xeb   :  { %528 = vperm.xlu2 %865, %v1029_v9  }
  0xec   :  { %v1223_v35 = vadd.f32 %v453_v29, %v445_v32  ;;  %v1225_v33 = vadd.f32 %v454_v46, %v446_v27 }
  0xf1   :  { %866 = vset.pattern.permute.xlu1 %v977_v22  ;;  %868 = vset.pattern.permute.xlu0 %v978_v23 }
  0xf2   :  { %538 = vperm.xlu1 %866, %v1029_v9   ;;  %558 = vperm.xlu0 %868, %v1029_v9  }
  0xf3   :  { %867 = vset.pattern.permute.xlu2 %v979_v31 }
  0xf4   :  { %548 = vperm.xlu2 %867, %v1029_v9  }
  0xfa   :  { %869 = vset.pattern.permute.xlu1 %v975_v4  ;;  %873 = vset.pattern.permute.xlu0 %v959_v6 }
  0xfb   :  { %568 = vperm.xlu1 %869, %v1021_v7   ;;  %626 = vperm.xlu0 %873, %v1038_v12  }
  0xfc   :  { %870 = vset.pattern.permute.xlu2 %v957_v2  ;;  %v296_v2 = vpop.permute.xlu0 %295 }
  0xfd   :  { %584 = vperm.xlu2 %870, %v1038_v12   ;;  %v299_v29 = vmul.f32 %v296_v2, %v1126_v40 }
 0x103   :  { %874 = vset.pattern.permute.xlu1 %v960_v8  ;;  %877 = vset.pattern.permute.xlu0 %v961_v10 }
 0x104   :  { %632 = vperm.xlu1 %874, %v1038_v12  }
 0x105   :  { %871 = vset.pattern.permute.xlu2 %v956_v1 }
 0x106   :  { %596 = vperm.xlu2 %871, %v1038_v12  }
 0x109   :  { %v333_v6 = vpop.permute.xlu2 %332 }
 0x10c   :  { %876 = vset.pattern.permute.xlu1 %v963_v13 }
 0x10d   :  { %674 = vperm.xlu1 %876, %v1038_v12  }
 0x10e   :  { %872 = vset.pattern.permute.xlu2 %v955_v0 }
 0x10f   :  { %610 = vperm.xlu2 %872, %v1038_v12  }
 0x111   :  { %v237_v10 = vpop.permute.xlu2 %236 }
 0x115   :  { %878 = vset.pattern.permute.xlu1 %v965_v15 }
 0x117   :  { %875 = vset.pattern.permute.xlu2 %v962_v11 }
 0x118   :  { %662 = vperm.xlu2 %875, %v1038_v12   ;;  %v298_v12 = vmul.f32 %v296_v2, %v1124_v44  ;;  %v1301_v2 = vsel %vm65_vm12, 1.0, %v968_v57 }
 0x119   :  { %v305_v0 = vpop.permute.xlu2 %304  ;;  %v75_v57 = vsub.f32 1.0, %v1301_v2 }
 0x120   :  { %879 = vset.pattern.permute.xlu2 %v964_v14 }
 0x121   :  { %v252_v1 = vpop.permute.xlu1 %251  ;;  %v320_v15 = vpop.permute.xlu2 %319 }
 0x122   :  { %v250_v7 = vpop.permute.xlu0 %249 }
 0x123   :  { %v255_v14 = vsel %vm253_vm5, %v252_v1, %v250_v7  ;;  %v254_v46 = vsel %vm253_vm5, %v250_v7, %v252_v1 }
 0x124   :  { %v260_v50 = vmul.f32 %v1110_v41, %v255_v14  ;;  %v261_v18 = vmul.f32 %v1110_v41, %v254_v46 }
 0x129   :  { %v239_v8 = vpop.permute.xlu1 %238 }
 0x12a   :  { %v335_v9 = vpop.permute.xlu0 %334  ;;  %v242_v11 = vsel %vm240_vm4, %v239_v8, %v237_v10  ;;  %v241_v16 = vsel %vm240_vm4, %v237_v10, %v239_v8 }
 0x12b   :  { %v247_v26 = vmul.f32 %v1101_v39, %v242_v11  ;;  %v248_v27 = vmul.f32 %v1101_v39, %v241_v16  ;;  %v337_v41 = vsel %vm336_vm10, %v333_v6, %v335_v9  ;;  %v338_v22 = vsel %vm336_vm10, %v335_v9, %v333_v6 }
 0x12c   :  { %v343_v6 = vmul.f32 %v1196_v37, %v337_v41  ;;  %v344_v8 = vmul.f32 %v1196_v37, %v338_v22 }
 0x12d   :  { %v262_v60 = vadd.f32 %v260_v50, %v247_v26  ;;  %v263_v10 = vadd.f32 %v261_v18, %v248_v27  ;;  %v472_v18 = vperm.slane %v1185_v30, 6 }
 0x131   :  { %v267_v13 = vpop.permute.xlu1 %266 }
 0x132   :  { %v265_v43 = vpop.permute.xlu0 %264 }
 0x133   :  { %v270_v28 = vsel %vm268_vm6, %v267_v13, %v265_v43  ;;  %v269_v61 = vsel %vm268_vm6, %v265_v43, %v267_v13  ;;  %v348_v13 = vpop.permute.xlu2 %347 }
 0x134   :  { %v275_v25 = vmul.f32 %v1120_v36, %v270_v28  ;;  %v276_v43 = vmul.f32 %v1120_v36, %v269_v61 }
 0x136   :  { %v278_v36 = vadd.f32 %v276_v43, %v263_v10 }
 0x139   :  { %v284_v38 = vpop.permute.xlu1 %283 }
 0x13a   :  { %v282_v51 = vpop.permute.xlu0 %281 }
 0x13b   :  { %v287_v47 = vsel %vm285_vm7, %v284_v38, %v282_v51  ;;  %v286_v49 = vsel %vm285_vm7, %v282_v51, %v284_v38 }
 0x13c   :  { %v292_v59 = vmul.f32 %v1148_v19, %v287_v47  ;;  %v293_v63 = vmul.f32 %v1148_v19, %v286_v49  ;;  %v277_v19 = vadd.f32 %v275_v25, %v262_v60  ;;  %v461_v49 = vperm.slane %v1183_v21, 5 }
 0x13d   :  { %v481_v60 = vperm.slane %v1183_v21, 7 }
 0x13e   :  { %v300_v1 = vadd.f32 %v298_v12, %v292_v59  ;;  %v301_v9 = vadd.f32 %v299_v29, %v293_v63  ;;  %v279_v38 = vmul.f32 %v1270_v48, %v277_v19  ;;  %v482_v63 = vperm.slane %v1185_v30, 7 }
 0x141   :  { %v303_v44 = vpop.permute.xlu1 %302 }
 0x142   :  { %v322_v40 = vpop.permute.xlu0 %321  ;;  %v307_v58 = vsel %vm306_vm9, %v303_v44, %v305_v0  ;;  %v308_v24 = vsel %vm306_vm9, %v305_v0, %v303_v44 }
 0x143   :  { %v324_v3 = vsel %vm323_vm11, %v320_v15, %v322_v40  ;;  %v325_v32 = vsel %vm323_vm11, %v322_v40, %v320_v15  ;;  %v313_v23 = vmul.f32 %v1162_v42, %v307_v58  ;;  %v314_v31 = vmul.f32 %v1162_v42, %v308_v24 }
 0x144   :  { %v330_v39 = vmul.f32 %v1181_v5, %v324_v3  ;;  %v331_v7 = vmul.f32 %v1181_v5, %v325_v32  ;;  %v462_v40 = vperm.slane %v1185_v30, 5  ;;  %v479_v3 = vpop.permute.xlu2 %478 }
 0x145   :  { %v315_v42 = vadd.f32 %v313_v23, %v300_v1  ;;  %v316_v51 = vadd.f32 %v314_v31, %v301_v9  ;;  %v483_v1 = vmul.f32 %v481_v60, %v479_v3 }
 0x146   :  { %v345_v12 = vadd.f32 %v343_v6, %v330_v39  ;;  %v346_v37 = vadd.f32 %v344_v8, %v331_v7  ;;  %v484_v39 = vmul.f32 %v482_v63, %v479_v3 }
 0x147   :  { %v317_v28 = vadd.f32 %v315_v42, %v279_v38  ;;  %v318_v26 = vadd.f32 %v316_v51, %v278_v36 }
 0x149   :  { %v469_v50 = vpop.permute.xlu1 %468 }
 0x14a   :  { %v350_v0 = vpop.permute.xlu0 %349  ;;  %v474_v22 = vmul.f32 %v472_v18, %v469_v50 }
 0x14b   :  { %v352_v5 = vsel %vm351_vm13, %v348_v13, %v350_v0  ;;  %v353_v11 = vsel %vm351_vm13, %v350_v0, %v348_v13 }
 0x14c   :  { %v358_v14 = vmul.f32 %v1203_v20, %v352_v5  ;;  %v359_v15 = vmul.f32 %v1203_v20, %v353_v11  ;;  %v471_v20 = vperm.slane %v1183_v21, 6 }
 0x14e   :  { %v360_v29 = vadd.f32 %v358_v14, %v345_v12  ;;  %v361_v46 = vadd.f32 %v359_v15, %v346_v37  ;;  %v473_v41 = vmul.f32 %v471_v20, %v469_v50 }
 0x150   :  { %v363_v47 = vmul.f32 %v361_v46, %v75_v57  ;;  %v364_v44 = vadd.f32 %v360_v29, %v317_v28 }
 0x152   :  { %v365_v16 = vadd.f32 %v363_v47, %v318_v26  ;;  %v370_v25 = vadd.f32 %v1170_v17, %v364_v44  ;;  %v459_v58 = vpop.permute.xlu0 %458  ;;  %v489_v0 = vpop.permute.xlu1 %488 }
 0x153   :  { %v463_v59 = vmul.f32 %v461_v49, %v459_v58  ;;  %v464_v24 = vmul.f32 %v462_v40, %v459_v58 }
 0x154   :  { %v371_v32 = vadd.f32 %v1170_v17, %v365_v16  ;;  %v392_v27 = vmul.f32 0.044715, %v370_v25  ;;  %v390_v38 = vmul.f32 0.5, %v370_v25 }
 0x155   :  { %v465_v23 = vadd.f32 %v463_v59, %v1223_v35  ;;  %v466_v61 = vadd.f32 %v464_v24, %v1225_v33  ;;  %v499_v35 = vpop.permute.xlu2 %498 }
 0x156   :  { %v393_v19 = vmul.f32 0.044715, %v371_v32  ;;  %v394_v31 = vmul.f32 %v392_v27, %v370_v25  ;;  %v391_v11 = vmul.f32 0.5, %v371_v32 }
 0x157   :  { %v475_v7 = vadd.f32 %v473_v41, %v465_v23  ;;  %v476_v6 = vadd.f32 %v474_v22, %v466_v61 }
 0x158   :  { %v395_v8 = vmul.f32 %v393_v19, %v371_v32  ;;  %v396_v21 = vmul.f32 %v394_v31, %v370_v25 }
 0x159   :  { %v485_v9 = vadd.f32 %v483_v1, %v475_v7  ;;  %v486_v30 = vadd.f32 %v484_v39, %v476_v6 }
 0x15a   :  { %v397_v10 = vmul.f32 %v395_v8, %v371_v32  ;;  %v398_v13 = vadd.f32 %v396_v21, %v370_v25 }
 0x15b   :  { %v519_v14 = vpop.permute.xlu1 %518  ;;  %v509_v40 = vpop.permute.xlu0 %508 }
 0x15c   :  { %v399_v17 = vadd.f32 %v397_v10, %v371_v32  ;;  %v400_v43 = vmul.f32 0.7978846, %v398_v13 }
 0x15d   :  { %v529_v29 = vpop.permute.xlu2 %528 }
 0x15e   :  { %v401_v42 = vmul.f32 0.7978846, %v399_v17  ;;  %887 = vtanh.f32 %v400_v43 }
 0x160   :  { %889 = vtanh.f32 %v401_v42 }
 0x164   :  { %v888_v33 = vpop.eup %887  ;;  %v539_v19 = vpop.permute.xlu1 %538 }
 0x165   :  { %v404_v51 = vadd.f32 1.0, %v888_v33  ;;  %v559_v42 = vpop.permute.xlu0 %558 }
 0x166   :  { %v890_v5 = vpop.eup %889 }
 0x167   :  { %v405_v12 = vadd.f32 1.0, %v890_v5  ;;  %v406_v37 = vmul.f32 %v404_v51, %v390_v38 }
 0x169   :  { %v407_v15 = vmul.f32 %v405_v12, %v391_v11  ;;  %v491_v36 = vperm.slane %v406_v37, 0  ;;  %v501_v28 = vperm.slane %v406_v37, 1  ;;  %v511_v44 = vperm.slane %v406_v37, 2 }
 0x16a   :  { %v521_v49 = vperm.slane %v406_v37, 3  ;;  %v531_v18 = vperm.slane %v406_v37, 4  ;;  %v541_v32 = vperm.slane %v406_v37, 5  ;;  %v551_v6 = vperm.slane %v406_v37, 6 }
 0x16b   :  { %v492_v46 = vperm.slane %v407_v15, 0  ;;  %v493_v26 = vmul.f32 %v491_v36, %v489_v0  ;;  %v502_v47 = vperm.slane %v407_v15, 1  ;;  %v503_v58 = vmul.f32 %v501_v28, %v499_v35 }
 0x16c   :  { %v512_v25 = vperm.slane %v407_v15, 2  ;;  %v522_v20 = vperm.slane %v407_v15, 3  ;;  %v513_v63 = vmul.f32 %v511_v44, %v509_v40  ;;  %v532_v3 = vperm.slane %v407_v15, 4 }
 0x16d   :  { %v494_v50 = vmul.f32 %v492_v46, %v489_v0  ;;  %v495_v16 = vadd.f32 %v493_v26, %v485_v9  ;;  %v504_v24 = vmul.f32 %v502_v47, %v499_v35  ;;  %v523_v41 = vmul.f32 %v521_v49, %v519_v14  ;;  %v549_v9 = vpop.permute.xlu2 %548 }
 0x16e   :  { %v514_v22 = vmul.f32 %v512_v25, %v509_v40  ;;  %v524_v61 = vmul.f32 %v522_v20, %v519_v14  ;;  %v542_v31 = vperm.slane %v407_v15, 5  ;;  %v533_v7 = vmul.f32 %v531_v18, %v529_v29 }
 0x16f   :  { %v496_v59 = vadd.f32 %v494_v50, %v486_v30  ;;  %v505_v60 = vadd.f32 %v503_v58, %v495_v16  ;;  %v534_v8 = vmul.f32 %v532_v3, %v529_v29  ;;  %v561_v21 = vperm.slane %v406_v37, 7  ;;  %v569_v29 = vpop.permute.xlu1 %568 }
 0x170   :  { %v543_v13 = vmul.f32 %v541_v32, %v539_v19  ;;  %v552_v17 = vperm.slane %v407_v15, 6  ;;  %v544_v43 = vmul.f32 %v542_v31, %v539_v19  ;;  %v562_v33 = vperm.slane %v407_v15, 7 }
 0x171   :  { %v506_v27 = vadd.f32 %v504_v24, %v496_v59  ;;  %v515_v23 = vadd.f32 %v513_v63, %v505_v60  ;;  %v553_v38 = vmul.f32 %v551_v6, %v549_v9  ;;  %v563_v5 = vmul.f32 %v561_v21, %v559_v42  ;;  %v627_v6 = vpop.permute.xlu0 %626 }
 0x172   :  { %v554_v11 = vmul.f32 %v552_v17, %v549_v9  ;;  %v564_v14 = vmul.f32 %v562_v33, %v559_v42 }
 0x173   :  { %v516_v1 = vadd.f32 %v514_v22, %v506_v27  ;;  %v525_v39 = vadd.f32 %v523_v41, %v515_v23 }
 0x175   :  { %v526_v30 = vadd.f32 %v524_v61, %v516_v1  ;;  %v535_v10 = vadd.f32 %v533_v7, %v525_v39  ;;  %v585_v31 = vpop.permute.xlu2 %584 }
 0x177   :  { %v536_v0 = vadd.f32 %v534_v8, %v526_v30  ;;  %v545_v35 = vadd.f32 %v543_v13, %v535_v10  ;;  %v633_v39 = vpop.permute.xlu1 %632 }
 0x179   :  { %v546_v51 = vadd.f32 %v544_v43, %v536_v0  ;;  %v555_v12 = vadd.f32 %v553_v38, %v545_v35 }
 0x17b   :  { %v556_v36 = vadd.f32 %v554_v11, %v546_v51  ;;  %v565_v28 = vadd.f32 %v563_v5, %v555_v12 }
 0x17d   :  { %v566_v37 = vadd.f32 %v564_v14, %v556_v36  ;;  %v1329_v46 = vadd.f32 %v569_v29, %v565_v28  ;;  %v597_v1 = vpop.permute.xlu2 %596 }
 0x17f   :  { %v1331_v26 = vadd.f32 %v569_v29, %v566_v37  ;;  %v707_v47 = vmul.f32 0.044715, %v1329_v46  ;;  %589 = vrot.lane.b32.xlu0 %v1329_v46, %s966_s0  ;;  %v573_v25 = vmul.f32 %v1144_v45, %v1329_v46  ;;  %v705_v60 = vmul.f32 0.5, %v1329_v46  ;;  %v675_v8 = vpop.permute.xlu1 %674 }
 0x181   :  { %v708_v15 = vmul.f32 0.044715, %v1331_v26  ;;  %v709_v44 = vmul.f32 %v707_v47, %v1329_v46  ;;  %669 = vrot.lane.b32.xlu2 %v1331_v26, %s967_s29  ;;  %591 = vrot.lane.b32.xlu1 %v1331_v26, %s966_s0  ;;  %v574_v16 = vmul.f32 %v1141_v62, %v1331_v26  ;;  %v576_v62 = vmul.f32 %v1165_v53, %v1331_v26 }
 0x182   :  { %v706_v3 = vmul.f32 0.5, %v1331_v26  ;;  %v575_v53 = vmul.f32 %v1168_v55, %v1329_v46  ;;  %v899_v55 = vld [vmem:[#allocation2 + $0x8] sm:$0xff]  ;;  %v636_v29 = vmul.f32 %v633_v39, %v1331_v26 }
 0x183   :  { %v710_v49 = vmul.f32 %v708_v15, %v1331_v26  ;;  %v711_v40 = vmul.f32 %v709_v44, %v1329_v46 }
 0x185   :  { %v712_v50 = vmul.f32 %v710_v49, %v1331_v26  ;;  %v713_v58 = vadd.f32 %v711_v40, %v1329_v46  ;;  %v611_v7 = vpop.permute.xlu2 %610 }
 0x187   :  { %657 = vrot.lane.b32.xlu0 %v574_v16, %s973_s8  ;;  %v714_v20 = vadd.f32 %v712_v50, %v1331_v26  ;;  %v715_v18 = vmul.f32 0.7978846, %v713_v58 }
 0x189   :  { %579 = vrot.lane.b32.xlu1 %v574_v16, %s969_s30  ;;  %577 = vrot.lane.b32.xlu2 %v573_v25, %s969_s30  ;;  %v716_v59 = vmul.f32 0.7978846, %v714_v20  ;;  %891 = vtanh.f32 %v715_v18 }
 0x18b   :  { %893 = vtanh.f32 %v716_v59 }
 0x18d   :  { %v663_v21 = vpop.permute.xlu2 %662 }
 0x18f   :  { %v892_v24 = vpop.eup %891  ;;  %641 = vrot.lane.b32.xlu0 %v576_v62, %s971_s6 }
 0x190   :  { %v719_v63 = vadd.f32 1.0, %v892_v24 }
 0x191   :  { %v894_v45 = vpop.eup %893  ;;  %605 = vrot.lane.b32.xlu1 %v576_v62, %s970_s5  ;;  %655 = vrot.lane.b32.xlu2 %v573_v25, %s973_s8 }
 0x192   :  { %v720_v32 = vadd.f32 1.0, %v894_v45  ;;  %v721_v27 = vmul.f32 %v719_v63, %v705_v60 }
 0x194   :  { %v722_v41 = vmul.f32 %v720_v32, %v706_v3  ;;  %v753_v22 = vadd.f32 %v721_v27, %v1136_v52 }
 0x196   :  { %v754_v23 = vadd.f32 %v722_v41, %v1138_v56  ;;  %757 = vst [vmem:[#allocation5] sm:$0xf] %v753_v22  ;;  %v769_v61 = vrot.slane %v753_v22, 4  ;;  %v635_v41 = vmul.f32 %v633_v39, %v1329_v46 }
 0x197   :  { %603 = vrot.lane.b32.xlu0 %v575_v53, %s970_s5 }
 0x198   :  { %758 = vst [vmem:[#allocation5 + $0x8] sm:$0xf] %v754_v23  ;;  %v770_v19 = vrot.slane %v754_v23, 4 }
 0x199   :  { %621 = vrot.lane.b32.xlu1 %v574_v16, %s972_s7  ;;  %639 = vrot.lane.b32.xlu2 %v575_v53, %s971_s6  ;;  %773 = vst [vmem:[#allocation5 + $0x10] sm:$0xf] %v769_v61 }
 0x19a   :  { %774 = vst [vmem:[#allocation5 + $0x18] sm:$0xf] %v770_v19 }
 0x19f   :  { %619 = vrot.lane.b32.xlu0 %v573_v25, %s972_s7 }
 0x1a1   :  { %667 = vrot.lane.b32.xlu1 %v1329_v46, %s967_s29  ;;  %683 = vrot.lane.b32.xlu2 %v576_v62, %s974_s9 }
 0x1a7   :  { %646 = vperm.xlu0 %877, %v899_v55  }
 0x1a9   :  { %681 = vrot.lane.b32.xlu1 %v575_v53, %s974_s9  ;;  %700 = vperm.xlu2 %879, %v899_v55  }
 0x1af   :  { %882 = vset.pattern.permute.xlu0 %v976_v34 }
 0x1b1   :  { %688 = vperm.xlu1 %878, %v899_v55   ;;  %881 = vset.pattern.permute.xlu2 %v976_v34 }
 0x1b2   :  { %748 = vperm.xlu2 %881, %v899_v55  }
 0x1b9   :  { %880 = vset.pattern.permute.xlu1 %v975_v4 }
 0x1ba   :  { %742 = vperm.xlu1 %880, %v899_v55  }
 0x1db   :  { %v670_v10 = vpop.permute.xlu2 %669 }
 0x1e3   :  { %v578_v42 = vpop.permute.xlu2 %577 }
 0x1eb   :  { %v656_v33 = vpop.permute.xlu2 %655 }
 0x1f1   :  { %v590_v9 = vpop.permute.xlu0 %589 }
 0x1f3   :  { %v592_v30 = vpop.permute.xlu1 %591  ;;  %v640_v37 = vpop.permute.xlu2 %639 }
 0x1f4   :  { %v593_v11 = vsel %vm253_vm5, %v590_v9, %v592_v30  ;;  %v594_v47 = vsel %vm253_vm5, %v592_v30, %v590_v9 }
 0x1f5   :  { %v600_v15 = vmul.f32 %v597_v1, %v593_v11  ;;  %v599_v18 = vmul.f32 %v597_v1, %v594_v47 }
 0x1f9   :  { %v658_v13 = vpop.permute.xlu0 %657 }
 0x1fa   :  { %v659_v23 = vsel %vm323_vm11, %v656_v33, %v658_v13  ;;  %v660_v61 = vsel %vm323_vm11, %v658_v13, %v656_v33 }
 0x1fb   :  { %v580_v17 = vpop.permute.xlu1 %579  ;;  %v666_v9 = vmul.f32 %v663_v21, %v660_v61 }
 0x1fc   :  { %v581_v38 = vsel %vm240_vm4, %v578_v42, %v580_v17  ;;  %v582_v14 = vsel %vm240_vm4, %v580_v17, %v578_v42 }
 0x1fd   :  { %v588_v36 = vmul.f32 %v585_v31, %v581_v38  ;;  %v587_v40 = vmul.f32 %v585_v31, %v582_v14 }
 0x1ff   :  { %v602_v25 = vadd.f32 %v600_v15, %v588_v36  ;;  %v601_v45 = vadd.f32 %v599_v18, %v587_v40 }
 0x201   :  { %v642_v43 = vpop.permute.xlu0 %641 }
 0x202   :  { %v644_v58 = vsel %vm306_vm9, %v642_v43, %v640_v37  ;;  %v643_v27 = vsel %vm306_vm9, %v640_v37, %v642_v43 }
 0x203   :  { %v606_v0 = vpop.permute.xlu1 %605 }
 0x209   :  { %v604_v34 = vpop.permute.xlu0 %603 }
 0x20a   :  { %v607_v12 = vsel %vm268_vm6, %v604_v34, %v606_v0  ;;  %v608_v44 = vsel %vm268_vm6, %v606_v0, %v604_v34 }
 0x20b   :  { %v622_v35 = vpop.permute.xlu1 %621  ;;  %v614_v49 = vmul.f32 %v611_v7, %v607_v12  ;;  %v613_v59 = vmul.f32 %v611_v7, %v608_v44  ;;  %v684_v7 = vpop.permute.xlu2 %683 }
 0x20d   :  { %v616_v24 = vadd.f32 %v614_v49, %v602_v25  ;;  %v615_v19 = vadd.f32 %v613_v59, %v601_v45 }
 0x211   :  { %v620_v4 = vpop.permute.xlu0 %619 }
 0x212   :  { %v623_v51 = vsel %vm285_vm7, %v620_v4, %v622_v35  ;;  %v624_v50 = vsel %vm285_vm7, %v622_v35, %v620_v4 }
 0x213   :  { %v668_v5 = vpop.permute.xlu1 %667  ;;  %v630_v28 = vmul.f32 %v627_v6, %v623_v51  ;;  %v629_v60 = vmul.f32 %v627_v6, %v624_v50  ;;  %v665_v6 = vmul.f32 %v663_v21, %v659_v23  ;;  %v701_v4 = vpop.permute.xlu2 %700 }
 0x214   :  { %v671_v3 = vsel %vm336_vm10, %v668_v5, %v670_v10  ;;  %v672_v32 = vsel %vm336_vm10, %v670_v10, %v668_v5  ;;  %v617_v10 = vmul.f32 %v1270_v48, %v615_v19 }
 0x215   :  { %v638_v20 = vadd.f32 %v636_v29, %v630_v28  ;;  %v677_v55 = vmul.f32 %v675_v8, %v671_v3  ;;  %v678_v31 = vmul.f32 %v675_v8, %v672_v32  ;;  %v637_v1 = vadd.f32 %v635_v41, %v629_v60 }
 0x217   :  { %v679_v43 = vadd.f32 %v677_v55, %v665_v6  ;;  %v680_v42 = vadd.f32 %v678_v31, %v666_v9 }
 0x219   :  { %v647_v16 = vpop.permute.xlu0 %646 }
 0x21a   :  { %v650_v26 = vmul.f32 %v647_v16, %v644_v58  ;;  %v649_v22 = vmul.f32 %v647_v16, %v643_v27 }
 0x21b   :  { %v682_v62 = vpop.permute.xlu1 %681  ;;  %v749_v44 = vpop.permute.xlu2 %748 }
 0x21c   :  { %v652_v63 = vadd.f32 %v650_v26, %v638_v20  ;;  %v651_v30 = vadd.f32 %v649_v22, %v637_v1  ;;  %v685_v46 = vsel %vm351_vm13, %v682_v62, %v684_v7  ;;  %v686_v39 = vsel %vm351_vm13, %v684_v7, %v682_v62 }
 0x21e   :  { %v654_v53 = vadd.f32 %v652_v63, %v616_v24  ;;  %v653_v34 = vadd.f32 %v651_v30, %v617_v10 }
 0x223   :  { %v689_v17 = vpop.permute.xlu1 %688 }
 0x224   :  { %v691_v13 = vmul.f32 %v689_v17, %v685_v46  ;;  %v692_v0 = vmul.f32 %v689_v17, %v686_v39 }
 0x226   :  { %v693_v8 = vadd.f32 %v691_v13, %v679_v43  ;;  %v694_v35 = vadd.f32 %v692_v0, %v680_v42 }
 0x228   :  { %v696_v21 = vmul.f32 %v694_v35, %v75_v57  ;;  %v697_v33 = vadd.f32 %v693_v8, %v653_v34 }
 0x22a   :  { %v698_v48 = vadd.f32 %v696_v21, %v654_v53  ;;  %v703_v38 = vadd.f32 %v701_v4, %v697_v33 }
 0x22c   :  { %v704_v51 = vadd.f32 %v701_v4, %v698_v48  ;;  %v725_v5 = vmul.f32 0.044715, %v703_v38  ;;  %v743_v15 = vpop.permute.xlu1 %742  ;;  %v723_v40 = vmul.f32 0.5, %v703_v38 }
 0x22d   :  { %v745_v2 = vmul.f32 %v743_v15, %v1136_v52  ;;  %v746_v49 = vmul.f32 %v743_v15, %v1138_v56 }
 0x22e   :  { %v726_v11 = vmul.f32 0.044715, %v704_v51  ;;  %v727_v54 = vmul.f32 %v725_v5, %v703_v38  ;;  %v724_v58 = vmul.f32 0.5, %v704_v51 }
 0x22f   :  { %v751_v26 = vadd.f32 %v749_v44, %v745_v2  ;;  %v752_v59 = vadd.f32 %v749_v44, %v746_v49 }
 0x230   :  { %v728_v12 = vmul.f32 %v726_v11, %v704_v51  ;;  %v729_v14 = vmul.f32 %v727_v54, %v703_v38 }
 0x232   :  { %v730_v36 = vmul.f32 %v728_v12, %v704_v51  ;;  %v731_v28 = vadd.f32 %v729_v14, %v703_v38 }
 0x234   :  { %v732_v29 = vadd.f32 %v730_v36, %v704_v51  ;;  %v733_v37 = vmul.f32 0.7978846, %v731_v28 }
 0x236   :  { %v734_v47 = vmul.f32 0.7978846, %v732_v29  ;;  %895 = vtanh.f32 %v733_v37 }
 0x238   :  { %897 = vtanh.f32 %v734_v47 }
 0x23c   :  { %v896_v57 = vpop.eup %895 }
 0x23d   :  { %v737_v50 = vadd.f32 1.0, %v896_v57 }
 0x23e   :  { %v898_v16 = vpop.eup %897 }
 0x23f   :  { %v738_v25 = vadd.f32 1.0, %v898_v16  ;;  %v739_v20 = vmul.f32 %v737_v50, %v723_v40 }
 0x241   :  { %v740_v18 = vmul.f32 %v738_v25, %v724_v58  ;;  %v755_v62 = vadd.f32 %v751_v26, %v739_v20 }
 0x243   :  { %v756_v52 = vadd.f32 %v752_v59, %v740_v18  ;;  %v761_v24 = vrot.slane %v755_v62, 4  ;;  %775 = vst [vmem:[#allocation5 + $0x10] sm:$0xf0] %v755_v62 }
 0x245   :  { %v762_v56 = vrot.slane %v756_v52, 4  ;;  %765 = vst [vmem:[#allocation5] sm:$0xf0] %v761_v24 }
 0x246   :  { %776 = vst [vmem:[#allocation5 + $0x18] sm:$0xf0] %v756_v52 }
 0x247   :  { %766 = vst [vmem:[#allocation5 + $0x8] sm:$0xf0] %v762_v56 }
 0x248   :  { %789 = dma.vmem_to_hbm [thread:$0]  %s782_s14, 512, %s784_s12, [#allocation4], %s981_s15, %s981_s15, %s966_s0  }
 0x249   :  { %950 = dma.done.wait [#allocation4], 512  }
 0x24a   :  { %951 = vsyncadd [#allocation4], 4294966784 }
 0x24b   :  { %794 = vsyncpa [#allocation3], 1 }
 0x24c   :  { %795 = vsyncpa [#allocation4], 1 }

</bundles_post_ra>
